<compile_context>
chip_gen: v7x
topology: tpu7x:2x2x1
jax: 0.10.0
libtpu: 0.0.40
codegen_flags: <defaults>
</compile_context>

<pallas_src>
import functools

import jax
import jax.numpy as jnp
import numpy as np
from jax.experimental import pallas as pl
from jax.experimental.pallas import tpu as pltpu


# ----------------------------------------------------------------------------
# Fused Pallas kernel
# ----------------------------------------------------------------------------
def _lstm_cell(gates, c, hidden):
    """gates: (B, 4H) pre-activations in PyTorch order (i, f, g, o)."""
    H = hidden
    sig = jax.nn.sigmoid(gates)          # full-vreg EUP op
    tnh = jnp.tanh(gates)                # full-vreg EUP op
    i = sig[:, 0 * H:1 * H]
    f = sig[:, 1 * H:2 * H]
    g = tnh[:, 2 * H:3 * H]
    o = sig[:, 3 * H:4 * H]
    c_new = f * c + i * g
    h_new = o * jnp.tanh(c_new)
    return h_new, c_new


def _bilstm_kernel(x_ref, *refs, hidden, seq_len, batch, num_layers):
    """Whole BiLSTM + linear head in one kernel.

    Ref layout (inputs):
      x_ref                     : (T*B, D_in)   time-major, flattened
      per layer l               : wih (2, d_in_l, 4H), whh (2, H, 4H), b (2, 1, 4H)
      h0, c0                    : (2L, B, H)    PyTorch index order layer*2 + dir
      lin_w                     : (2H, O), lin_b : (1, O)
    Output:
      out_ref                   : (B, O)
    Scratch:
      seqf_ref, seqb_ref        : (T*B, H)  per-direction layer outputs (reused)
    """
    H, T, B, L = hidden, seq_len, batch, num_layers
    f32 = jnp.float32

    layer_w = [(refs[3 * l], refs[3 * l + 1], refs[3 * l + 2]) for l in range(L)]
    base = 3 * L
    h0_ref, c0_ref, lw_ref, lb_ref, out_ref, seqf_ref, seqb_ref = refs[base:base + 7]

    prev_f = x_ref[...]          # layer-0 input (T*B, D_in), not direction-split
    prev_b = None

    for l in range(L):
        wih_ref, whh_ref, b_ref = layer_w[l]
        last = (l == L - 1)
        w_f, w_b = wih_ref[0], wih_ref[1]
        bias_f, bias_b = b_ref[0], b_ref[1]
        whh_f, whh_b = whh_ref[0], whh_ref[1]

        def proj(src_f, src_b, w, bias):
            # Input projection for a whole (sub)sequence in one matmul.  For
            # layers > 0 the 2H input is kept split per direction -> no concat.
            if src_b is None:
                return jnp.dot(src_f, w, preferred_element_type=f32) + bias
            return (jnp.dot(src_f, w[0:H, :], preferred_element_type=f32)
                    + jnp.dot(src_b, w[H:2 * H, :], preferred_element_type=f32)
                    + bias)

        gxf = proj(prev_f, prev_b, w_f, bias_f)                  # (T*B, 4H)
        if last:
            # Backward direction of the last layer only contributes its
            # t = T-1 output (one recurrence step from the initial state).
            rows = slice((T - 1) * B, T * B)
            gxb = proj(prev_f[rows],
                       None if prev_b is None else prev_b[rows],
                       w_b, bias_b)                              # (B, 4H)
        else:
            gxb = proj(prev_f, prev_b, w_b, bias_b)              # (T*B, 4H)

        hf, cf = h0_ref[2 * l], c0_ref[2 * l]
        hb, cb = h0_ref[2 * l + 1], c0_ref[2 * l + 1]

        if last:
            # Forward: full recurrence, only the final h is consumed.
            for t in range(T):
                gf = gxf[t * B:(t + 1) * B, :] + jnp.dot(
                    hf, whh_f, preferred_element_type=f32)
                hf, cf = _lstm_cell(gf, cf, H)
            # Backward: single step (timestep T-1).
            gb = gxb + jnp.dot(hb, whh_b, preferred_element_type=f32)
            hb, _ = _lstm_cell(gb, cb, H)
            # Fused linear head: concat(hf, hb) @ lin_w + lin_b, split in two.
            lw = lw_ref[...]
            out_ref[...] = (jnp.dot(hf, lw[0:H, :], preferred_element_type=f32)
                            + jnp.dot(hb, lw[H:2 * H, :],
                                      preferred_element_type=f32)
                            + lb_ref[...])
        else:
            # Both directions fused in one fully-unrolled loop (independent
            # per-step work -> instruction-level parallelism).
            for t in range(T):
                tb = T - 1 - t
                gf = gxf[t * B:(t + 1) * B, :] + jnp.dot(
                    hf, whh_f, preferred_element_type=f32)
                gb = gxb[tb * B:(tb + 1) * B, :] + jnp.dot(
                    hb, whh_b, preferred_element_type=f32)
                hf, cf = _lstm_cell(gf, cf, H)
                hb, cb = _lstm_cell(gb, cb, H)
                seqf_ref[pl.ds(t * B, B), :] = hf
                seqb_ref[pl.ds(tb * B, B), :] = hb
            prev_f = seqf_ref[...]
            prev_b = seqb_ref[...]

    # TODO(synk): on v7x the two directions could be split across the 2
    # TensorCores (core_map / parallel grid axis); skipped here because full
    # single-kernel fusion is the bigger win at these shapes.


# ----------------------------------------------------------------------------
# Wrapper
# ----------------------------------------------------------------------------
def bilstm_forward(x, lstm_params, lin_w, lin_b, h0, c0, *, num_layers, hidden):
    """x: (B, T, input_size) -> (B, output_size)."""
    B, T, D = x.shape
    H = hidden
    O = lin_w.shape[-1]
    x_flat = jnp.transpose(x, (1, 0, 2)).reshape(T * B, D)      # time-major

    args = [x_flat]
    for l in range(num_layers):
        wih = jnp.stack([lstm_params[2 * l][0], lstm_params[2 * l + 1][0]])
        whh = jnp.stack([lstm_params[2 * l][1], lstm_params[2 * l + 1][1]])
        b = jnp.stack([lstm_params[2 * l][2], lstm_params[2 * l + 1][2]])
        args += [wih, whh, b]
    args += [h0, c0, lin_w, lin_b]

    kernel = functools.partial(_bilstm_kernel, hidden=H, seq_len=T,
                               batch=B, num_layers=num_layers)
    return pl.pallas_call(
        kernel,
        out_shape=jax.ShapeDtypeStruct((B, O), jnp.float32),
        scratch_shapes=[pltpu.VMEM((T * B, H), jnp.float32),
                        pltpu.VMEM((T * B, H), jnp.float32)],
    )(*args)


# ----------------------------------------------------------------------------
# Pure-JAX reference (same math, lax.scan) for a sanity check
# ----------------------------------------------------------------------------
def ref_forward(x, lstm_params, lin_w, lin_b, h0, c0, *, num_layers, hidden):
    H = hidden
    cur = jnp.transpose(x, (1, 0, 2))
    for layer in range(num_layers):
        outs = []
        for d in range(2):
            idx = layer * 2 + d
            w_ih, w_hh, b = lstm_params[idx]
            inp = cur if d == 0 else cur[::-1]

            def step(carry, x_t, w_ih=w_ih, w_hh=w_hh, b=b):
                h, c = carry
                gates = x_t @ w_ih + h @ w_hh + b
                i = jax.nn.sigmoid(gates[:, :H])
                f = jax.nn.sigmoid(gates[:, H:2 * H])
                g = jnp.tanh(gates[:, 2 * H:3 * H])
                o = jax.nn.sigmoid(gates[:, 3 * H:])
                c = f * c + i * g
                h = o * jnp.tanh(c)
                return (h, c), h

            _, hs = jax.lax.scan(step, (h0[idx], c0[idx]), inp)
            if d == 1:
                hs = hs[::-1]
            outs.append(hs)
        cur = jnp.concatenate(outs, axis=-1)
    return cur[-1] @ lin_w + lin_b


# ----------------------------------------------------------------------------
# Deterministic parameter init (PyTorch-style uniform(-1/sqrt(H), 1/sqrt(H)))
# ----------------------------------------------------------------------------
def init_params(key, input_size, hidden, num_layers, output_size):
    k = 1.0 / np.sqrt(hidden)
    lstm_params = []
    for layer in range(num_layers):
        d_in = input_size if layer == 0 else 2 * hidden
        for _direction in range(2):
            key, k1, k2, k3, k4 = jax.random.split(key, 5)
            w_ih = jax.random.uniform(k1, (d_in, 4 * hidden), jnp.float32, -k, k)
            w_hh = jax.random.uniform(k2, (hidden, 4 * hidden), jnp.float32, -k, k)
            b_ih = jax.random.uniform(k3, (1, 4 * hidden), jnp.float32, -k, k)
            b_hh = jax.random.uniform(k4, (1, 4 * hidden), jnp.float32, -k, k)
            lstm_params.append((w_ih, w_hh, b_ih + b_hh))
    kf = 1.0 / np.sqrt(2 * hidden)
    key, k1, k2 = jax.random.split(key, 3)
    lin_w = jax.random.uniform(k1, (2 * hidden, output_size), jnp.float32, -kf, kf)
    lin_b = jax.random.uniform(k2, (1, output_size), jnp.float32, -kf, kf)
    return lstm_params, lin_w, lin_b, key


# ----------------------------------------------------------------------------
if __name__ == "__main__":
    B, T, INPUT, HIDDEN, LAYERS, OUTPUT = 2, 8, 4, 32, 2, 1

    key = jax.random.PRNGKey(0)
    lstm_params, lin_w, lin_b, key = init_params(key, INPUT, HIDDEN, LAYERS, OUTPUT)

    key, kx, kh, kc = jax.random.split(key, 4)
    x = jax.random.normal(kx, (B, T, INPUT), jnp.float32)
    # PyTorch forward draws random h_0/c_0 each call; here they are drawn once,
    # deterministically, from PRNGKey(0).
    h0 = jax.random.normal(kh, (2 * LAYERS, B, HIDDEN), jnp.float32)
    c0 = jax.random.normal(kc, (2 * LAYERS, B, HIDDEN), jnp.float32)

    fwd = jax.jit(functools.partial(bilstm_forward,
                                    num_layers=LAYERS, hidden=HIDDEN))
    pred = jax.block_until_ready(fwd(x, lstm_params, lin_w, lin_b, h0, c0))

    ref = jax.block_until_ready(
        ref_forward(x, lstm_params, lin_w, lin_b, h0, c0,
                    num_layers=LAYERS, hidden=HIDDEN))

    assert pred.shape == (B, OUTPUT), pred.shape
    np.testing.assert_allclose(np.asarray(pred), np.asarray(ref),
                               rtol=2e-3, atol=2e-3)
    print("KERNEL_OK")
</pallas_src>

<mosaic_0001>
module attributes {stable_mosaic.version = 11 : i64} {
  func.func @_bilstm_kernel(%arg0: memref<16x4xf32, #tpu.memory_space<vmem>>, %arg1: memref<2x4x128xf32, #tpu.memory_space<vmem>>, %arg2: memref<2x32x128xf32, #tpu.memory_space<vmem>>, %arg3: memref<2x1x128xf32, #tpu.memory_space<vmem>>, %arg4: memref<2x64x128xf32, #tpu.memory_space<vmem>>, %arg5: memref<2x32x128xf32, #tpu.memory_space<vmem>>, %arg6: memref<2x1x128xf32, #tpu.memory_space<vmem>>, %arg7: memref<4x2x32xf32, #tpu.memory_space<vmem>>, %arg8: memref<4x2x32xf32, #tpu.memory_space<vmem>>, %arg9: memref<64x1xf32, #tpu.memory_space<vmem>>, %arg10: memref<1x1xf32, #tpu.memory_space<vmem>>, %arg11: memref<2x1xf32, #tpu.memory_space<vmem>>, %arg12: memref<16x32xf32, #tpu.memory_space<vmem>>, %arg13: memref<16x32xf32, #tpu.memory_space<vmem>>) attributes {dimension_semantics = [], scalar_prefetch = 0 : i64, scratch_operands = 2 : i64, tpu.core_type = #tpu.core_type<tc>} {
    %c0 = arith.constant 0 : index
    %c0_0 = arith.constant 0 : index
    %0 = vector.load %arg0[%c0, %c0_0] : memref<16x4xf32, #tpu.memory_space<vmem>>, vector<16x4xf32>
    %c0_1 = arith.constant 0 : index
    %c0_2 = arith.constant 0 : index
    %c0_3 = arith.constant 0 : index
    %1 = vector.load %arg1[%c0_1, %c0_2, %c0_3] : memref<2x4x128xf32, #tpu.memory_space<vmem>>, vector<1x4x128xf32>
    %2 = vector.shape_cast %1 : vector<1x4x128xf32> to vector<4x128xf32>
    %c1 = arith.constant 1 : index
    %c0_4 = arith.constant 0 : index
    %c0_5 = arith.constant 0 : index
    %3 = vector.load %arg1[%c1, %c0_4, %c0_5] : memref<2x4x128xf32, #tpu.memory_space<vmem>>, vector<1x4x128xf32>
    %4 = vector.shape_cast %3 : vector<1x4x128xf32> to vector<4x128xf32>
    %c0_6 = arith.constant 0 : index
    %c0_7 = arith.constant 0 : index
    %c0_8 = arith.constant 0 : index
    %5 = vector.load %arg3[%c0_6, %c0_7, %c0_8] : memref<2x1x128xf32, #tpu.memory_space<vmem>>, vector<1x1x128xf32>
    %6 = vector.shape_cast %5 : vector<1x1x128xf32> to vector<1x128xf32>
    %c1_9 = arith.constant 1 : index
    %c0_10 = arith.constant 0 : index
    %c0_11 = arith.constant 0 : index
    %7 = vector.load %arg3[%c1_9, %c0_10, %c0_11] : memref<2x1x128xf32, #tpu.memory_space<vmem>>, vector<1x1x128xf32>
    %8 = vector.shape_cast %7 : vector<1x1x128xf32> to vector<1x128xf32>
    %c0_12 = arith.constant 0 : index
    %c0_13 = arith.constant 0 : index
    %c0_14 = arith.constant 0 : index
    %9 = vector.load %arg2[%c0_12, %c0_13, %c0_14] : memref<2x32x128xf32, #tpu.memory_space<vmem>>, vector<1x32x128xf32>
    %10 = vector.shape_cast %9 : vector<1x32x128xf32> to vector<32x128xf32>
    %c1_15 = arith.constant 1 : index
    %c0_16 = arith.constant 0 : index
    %c0_17 = arith.constant 0 : index
    %11 = vector.load %arg2[%c1_15, %c0_16, %c0_17] : memref<2x32x128xf32, #tpu.memory_space<vmem>>, vector<1x32x128xf32>
    %12 = vector.shape_cast %11 : vector<1x32x128xf32> to vector<32x128xf32>
    %cst = arith.constant dense<0.000000e+00> : vector<16x128xf32>
    %13 = tpu.matmul %0, %2, %cst {dimension_numbers = #tpu.dot_dimension_numbers<[1], [0], [0], [1], [0, 0, 1, 1], [], []>} : vector<16x4xf32>, vector<4x128xf32>, vector<16x128xf32> -> vector<16x128xf32>
    %14 = vector.broadcast %6 : vector<1x128xf32> to vector<16x128xf32>
    %15 = arith.addf %13, %14 : vector<16x128xf32>
    %cst_18 = arith.constant dense<0.000000e+00> : vector<16x128xf32>
    %16 = tpu.matmul %0, %4, %cst_18 {dimension_numbers = #tpu.dot_dimension_numbers<[1], [0], [0], [1], [0, 0, 1, 1], [], []>} : vector<16x4xf32>, vector<4x128xf32>, vector<16x128xf32> -> vector<16x128xf32>
    %17 = vector.broadcast %8 : vector<1x128xf32> to vector<16x128xf32>
    %18 = arith.addf %16, %17 : vector<16x128xf32>
    %c0_19 = arith.constant 0 : index
    %c0_20 = arith.constant 0 : index
    %c0_21 = arith.constant 0 : index
    %19 = vector.load %arg7[%c0_19, %c0_20, %c0_21] : memref<4x2x32xf32, #tpu.memory_space<vmem>>, vector<1x2x32xf32>
    %20 = vector.shape_cast %19 : vector<1x2x32xf32> to vector<2x32xf32>
    %c0_22 = arith.constant 0 : index
    %c0_23 = arith.constant 0 : index
    %c0_24 = arith.constant 0 : index
    %21 = vector.load %arg8[%c0_22, %c0_23, %c0_24] : memref<4x2x32xf32, #tpu.memory_space<vmem>>, vector<1x2x32xf32>
    %22 = vector.shape_cast %21 : vector<1x2x32xf32> to vector<2x32xf32>
    %c1_25 = arith.constant 1 : index
    %c0_26 = arith.constant 0 : index
    %c0_27 = arith.constant 0 : index
    %23 = vector.load %arg7[%c1_25, %c0_26, %c0_27] : memref<4x2x32xf32, #tpu.memory_space<vmem>>, vector<1x2x32xf32>
    %24 = vector.shape_cast %23 : vector<1x2x32xf32> to vector<2x32xf32>
    %c1_28 = arith.constant 1 : index
    %c0_29 = arith.constant 0 : index
    %c0_30 = arith.constant 0 : index
    %25 = vector.load %arg8[%c1_28, %c0_29, %c0_30] : memref<4x2x32xf32, #tpu.memory_space<vmem>>, vector<1x2x32xf32>
    %26 = vector.shape_cast %25 : vector<1x2x32xf32> to vector<2x32xf32>
    %27 = vector.extract_strided_slice %15 {offsets = [0, 0], sizes = [2, 128], strides = [1, 1]} : vector<16x128xf32> to vector<2x128xf32>
    %cst_31 = arith.constant dense<0.000000e+00> : vector<2x128xf32>
    %28 = tpu.matmul %20, %10, %cst_31 {dimension_numbers = #tpu.dot_dimension_numbers<[1], [0], [0], [1], [0, 0, 1, 1], [], []>} : vector<2x32xf32>, vector<32x128xf32>, vector<2x128xf32> -> vector<2x128xf32>
    %29 = arith.addf %27, %28 : vector<2x128xf32>
    %30 = vector.extract_strided_slice %18 {offsets = [14, 0], sizes = [2, 128], strides = [1, 1]} : vector<16x128xf32> to vector<2x128xf32>
    %cst_32 = arith.constant dense<0.000000e+00> : vector<2x128xf32>
    %31 = tpu.matmul %24, %12, %cst_32 {dimension_numbers = #tpu.dot_dimension_numbers<[1], [0], [0], [1], [0, 0, 1, 1], [], []>} : vector<2x32xf32>, vector<32x128xf32>, vector<2x128xf32> -> vector<2x128xf32>
    %32 = arith.addf %30, %31 : vector<2x128xf32>
    %33 = arith.negf %29 : vector<2x128xf32>
    %34 = math.exp %33 : vector<2x128xf32>
    %cst_33 = arith.constant 1.000000e+00 : f32
    %35 = vector.broadcast %cst_33 : f32 to vector<2x128xf32>
    %36 = arith.addf %35, %34 : vector<2x128xf32>
    %37 = arith.divf %35, %36 : vector<2x128xf32>
    %38 = math.tanh %29 : vector<2x128xf32>
    %39 = vector.extract_strided_slice %37 {offsets = [0, 0], sizes = [2, 32], strides = [1, 1]} : vector<2x128xf32> to vector<2x32xf32>
    %40 = vector.extract_strided_slice %37 {offsets = [0, 32], sizes = [2, 32], strides = [1, 1]} : vector<2x128xf32> to vector<2x32xf32>
    %41 = vector.extract_strided_slice %38 {offsets = [0, 64], sizes = [2, 32], strides = [1, 1]} : vector<2x128xf32> to vector<2x32xf32>
    %42 = vector.extract_strided_slice %37 {offsets = [0, 96], sizes = [2, 32], strides = [1, 1]} : vector<2x128xf32> to vector<2x32xf32>
    %43 = arith.mulf %40, %22 : vector<2x32xf32>
    %44 = arith.mulf %39, %41 : vector<2x32xf32>
    %45 = arith.addf %43, %44 : vector<2x32xf32>
    %46 = math.tanh %45 : vector<2x32xf32>
    %47 = arith.mulf %42, %46 : vector<2x32xf32>
    %48 = arith.negf %32 : vector<2x128xf32>
    %49 = math.exp %48 : vector<2x128xf32>
    %cst_34 = arith.constant 1.000000e+00 : f32
    %50 = vector.broadcast %cst_34 : f32 to vector<2x128xf32>
    %51 = arith.addf %50, %49 : vector<2x128xf32>
    %52 = arith.divf %50, %51 : vector<2x128xf32>
    %53 = math.tanh %32 : vector<2x128xf32>
    %54 = vector.extract_strided_slice %52 {offsets = [0, 0], sizes = [2, 32], strides = [1, 1]} : vector<2x128xf32> to vector<2x32xf32>
    %55 = vector.extract_strided_slice %52 {offsets = [0, 32], sizes = [2, 32], strides = [1, 1]} : vector<2x128xf32> to vector<2x32xf32>
    %56 = vector.extract_strided_slice %53 {offsets = [0, 64], sizes = [2, 32], strides = [1, 1]} : vector<2x128xf32> to vector<2x32xf32>
    %57 = vector.extract_strided_slice %52 {offsets = [0, 96], sizes = [2, 32], strides = [1, 1]} : vector<2x128xf32> to vector<2x32xf32>
    %58 = arith.mulf %55, %26 : vector<2x32xf32>
    %59 = arith.mulf %54, %56 : vector<2x32xf32>
    %60 = arith.addf %58, %59 : vector<2x32xf32>
    %61 = math.tanh %60 : vector<2x32xf32>
    %62 = arith.mulf %57, %61 : vector<2x32xf32>
    %c0_35 = arith.constant 0 : index
    %c0_36 = arith.constant 0 : index
    %63 = vector.load %arg12[%c0_35, %c0_36] : memref<16x32xf32, #tpu.memory_space<vmem>>, vector<2x32xf32>
    tpu.vector_store %arg12[%c0_35, %c0_36], %47 {strides = array<i32>} : memref<16x32xf32, #tpu.memory_space<vmem>>, vector<2x32xf32>,
    %c14 = arith.constant 14 : index
    %c0_37 = arith.constant 0 : index
    %64 = vector.load %arg13[%c14, %c0_37] : memref<16x32xf32, #tpu.memory_space<vmem>>, vector<2x32xf32>
    tpu.vector_store %arg13[%c14, %c0_37], %62 {strides = array<i32>} : memref<16x32xf32, #tpu.memory_space<vmem>>, vector<2x32xf32>,
    %65 = vector.extract_strided_slice %15 {offsets = [2, 0], sizes = [2, 128], strides = [1, 1]} : vector<16x128xf32> to vector<2x128xf32>
    %cst_38 = arith.constant dense<0.000000e+00> : vector<2x128xf32>
    %66 = tpu.matmul %47, %10, %cst_38 {dimension_numbers = #tpu.dot_dimension_numbers<[1], [0], [0], [1], [0, 0, 1, 1], [], []>} : vector<2x32xf32>, vector<32x128xf32>, vector<2x128xf32> -> vector<2x128xf32>
    %67 = arith.addf %65, %66 : vector<2x128xf32>
    %68 = vector.extract_strided_slice %18 {offsets = [12, 0], sizes = [2, 128], strides = [1, 1]} : vector<16x128xf32> to vector<2x128xf32>
    %cst_39 = arith.constant dense<0.000000e+00> : vector<2x128xf32>
    %69 = tpu.matmul %62, %12, %cst_39 {dimension_numbers = #tpu.dot_dimension_numbers<[1], [0], [0], [1], [0, 0, 1, 1], [], []>} : vector<2x32xf32>, vector<32x128xf32>, vector<2x128xf32> -> vector<2x128xf32>
    %70 = arith.addf %68, %69 : vector<2x128xf32>
    %71 = arith.negf %67 : vector<2x128xf32>
    %72 = math.exp %71 : vector<2x128xf32>
    %cst_40 = arith.constant 1.000000e+00 : f32
    %73 = vector.broadcast %cst_40 : f32 to vector<2x128xf32>
    %74 = arith.addf %73, %72 : vector<2x128xf32>
    %75 = arith.divf %73, %74 : vector<2x128xf32>
    %76 = math.tanh %67 : vector<2x128xf32>
    %77 = vector.extract_strided_slice %75 {offsets = [0, 0], sizes = [2, 32], strides = [1, 1]} : vector<2x128xf32> to vector<2x32xf32>
    %78 = vector.extract_strided_slice %75 {offsets = [0, 32], sizes = [2, 32], strides = [1, 1]} : vector<2x128xf32> to vector<2x32xf32>
    %79 = vector.extract_strided_slice %76 {offsets = [0, 64], sizes = [2, 32], strides = [1, 1]} : vector<2x128xf32> to vector<2x32xf32>
    %80 = vector.extract_strided_slice %75 {offsets = [0, 96], sizes = [2, 32], strides = [1, 1]} : vector<2x128xf32> to vector<2x32xf32>
    %81 = arith.mulf %78, %45 : vector<2x32xf32>
    %82 = arith.mulf %77, %79 : vector<2x32xf32>
    %83 = arith.addf %81, %82 : vector<2x32xf32>
    %84 = math.tanh %83 : vector<2x32xf32>
    %85 = arith.mulf %80, %84 : vector<2x32xf32>
    %86 = arith.negf %70 : vector<2x128xf32>
    %87 = math.exp %86 : vector<2x128xf32>
    %cst_41 = arith.constant 1.000000e+00 : f32
    %88 = vector.broadcast %cst_41 : f32 to vector<2x128xf32>
    %89 = arith.addf %88, %87 : vector<2x128xf32>
    %90 = arith.divf %88, %89 : vector<2x128xf32>
    %91 = math.tanh %70 : vector<2x128xf32>
    %92 = vector.extract_strided_slice %90 {offsets = [0, 0], sizes = [2, 32], strides = [1, 1]} : vector<2x128xf32> to vector<2x32xf32>
    %93 = vector.extract_strided_slice %90 {offsets = [0, 32], sizes = [2, 32], strides = [1, 1]} : vector<2x128xf32> to vector<2x32xf32>
    %94 = vector.extract_strided_slice %91 {offsets = [0, 64], sizes = [2, 32], strides = [1, 1]} : vector<2x128xf32> to vector<2x32xf32>
    %95 = vector.extract_strided_slice %90 {offsets = [0, 96], sizes = [2, 32], strides = [1, 1]} : vector<2x128xf32> to vector<2x32xf32>
    %96 = arith.mulf %93, %60 : vector<2x32xf32>
    %97 = arith.mulf %92, %94 : vector<2x32xf32>
    %98 = arith.addf %96, %97 : vector<2x32xf32>
    %99 = math.tanh %98 : vector<2x32xf32>
    %100 = arith.mulf %95, %99 : vector<2x32xf32>
    %c2 = arith.constant 2 : index
    %c0_42 = arith.constant 0 : index
    %101 = vector.load %arg12[%c2, %c0_42] : memref<16x32xf32, #tpu.memory_space<vmem>>, vector<2x32xf32>
    tpu.vector_store %arg12[%c2, %c0_42], %85 {strides = array<i32>} : memref<16x32xf32, #tpu.memory_space<vmem>>, vector<2x32xf32>,
    %c12 = arith.constant 12 : index
    %c0_43 = arith.constant 0 : index
    %102 = vector.load %arg13[%c12, %c0_43] : memref<16x32xf32, #tpu.memory_space<vmem>>, vector<2x32xf32>
    tpu.vector_store %arg13[%c12, %c0_43], %100 {strides = array<i32>} : memref<16x32xf32, #tpu.memory_space<vmem>>, vector<2x32xf32>,
    %103 = vector.extract_strided_slice %15 {offsets = [4, 0], sizes = [2, 128], strides = [1, 1]} : vector<16x128xf32> to vector<2x128xf32>
    %cst_44 = arith.constant dense<0.000000e+00> : vector<2x128xf32>
    %104 = tpu.matmul %85, %10, %cst_44 {dimension_numbers = #tpu.dot_dimension_numbers<[1], [0], [0], [1], [0, 0, 1, 1], [], []>} : vector<2x32xf32>, vector<32x128xf32>, vector<2x128xf32> -> vector<2x128xf32>
    %105 = arith.addf %103, %104 : vector<2x128xf32>
    %106 = vector.extract_strided_slice %18 {offsets = [10, 0], sizes = [2, 128], strides = [1, 1]} : vector<16x128xf32> to vector<2x128xf32>
    %cst_45 = arith.constant dense<0.000000e+00> : vector<2x128xf32>
    %107 = tpu.matmul %100, %12, %cst_45 {dimension_numbers = #tpu.dot_dimension_numbers<[1], [0], [0], [1], [0, 0, 1, 1], [], []>} : vector<2x32xf32>, vector<32x128xf32>, vector<2x128xf32> -> vector<2x128xf32>
    %108 = arith.addf %106, %107 : vector<2x128xf32>
    %109 = arith.negf %105 : vector<2x128xf32>
    %110 = math.exp %109 : vector<2x128xf32>
    %cst_46 = arith.constant 1.000000e+00 : f32
    %111 = vector.broadcast %cst_46 : f32 to vector<2x128xf32>
    %112 = arith.addf %111, %110 : vector<2x128xf32>
    %113 = arith.divf %111, %112 : vector<2x128xf32>
    %114 = math.tanh %105 : vector<2x128xf32>
    %115 = vector.extract_strided_slice %113 {offsets = [0, 0], sizes = [2, 32], strides = [1, 1]} : vector<2x128xf32> to vector<2x32xf32>
    %116 = vector.extract_strided_slice %113 {offsets = [0, 32], sizes = [2, 32], strides = [1, 1]} : vector<2x128xf32> to vector<2x32xf32>
    %117 = vector.extract_strided_slice %114 {offsets = [0, 64], sizes = [2, 32], strides = [1, 1]} : vector<2x128xf32> to vector<2x32xf32>
    %118 = vector.extract_strided_slice %113 {offsets = [0, 96], sizes = [2, 32], strides = [1, 1]} : vector<2x128xf32> to vector<2x32xf32>
    %119 = arith.mulf %116, %83 : vector<2x32xf32>
    %120 = arith.mulf %115, %117 : vector<2x32xf32>
    %121 = arith.addf %119, %120 : vector<2x32xf32>
    %122 = math.tanh %121 : vector<2x32xf32>
    %123 = arith.mulf %118, %122 : vector<2x32xf32>
    %124 = arith.negf %108 : vector<2x128xf32>
    %125 = math.exp %124 : vector<2x128xf32>
    %cst_47 = arith.constant 1.000000e+00 : f32
    %126 = vector.broadcast %cst_47 : f32 to vector<2x128xf32>
    %127 = arith.addf %126, %125 : vector<2x128xf32>
    %128 = arith.divf %126, %127 : vector<2x128xf32>
    %129 = math.tanh %108 : vector<2x128xf32>
    %130 = vector.extract_strided_slice %128 {offsets = [0, 0], sizes = [2, 32], strides = [1, 1]} : vector<2x128xf32> to vector<2x32xf32>
    %131 = vector.extract_strided_slice %128 {offsets = [0, 32], sizes = [2, 32], strides = [1, 1]} : vector<2x128xf32> to vector<2x32xf32>
    %132 = vector.extract_strided_slice %129 {offsets = [0, 64], sizes = [2, 32], strides = [1, 1]} : vector<2x128xf32> to vector<2x32xf32>
    %133 = vector.extract_strided_slice %128 {offsets = [0, 96], sizes = [2, 32], strides = [1, 1]} : vector<2x128xf32> to vector<2x32xf32>
    %134 = arith.mulf %131, %98 : vector<2x32xf32>
    %135 = arith.mulf %130, %132 : vector<2x32xf32>
    %136 = arith.addf %134, %135 : vector<2x32xf32>
    %137 = math.tanh %136 : vector<2x32xf32>
    %138 = arith.mulf %133, %137 : vector<2x32xf32>
    %c4 = arith.constant 4 : index
    %c0_48 = arith.constant 0 : index
    %139 = vector.load %arg12[%c4, %c0_48] : memref<16x32xf32, #tpu.memory_space<vmem>>, vector<2x32xf32>
    tpu.vector_store %arg12[%c4, %c0_48], %123 {strides = array<i32>} : memref<16x32xf32, #tpu.memory_space<vmem>>, vector<2x32xf32>,
    %c10 = arith.constant 10 : index
    %c0_49 = arith.constant 0 : index
    %140 = vector.load %arg13[%c10, %c0_49] : memref<16x32xf32, #tpu.memory_space<vmem>>, vector<2x32xf32>
    tpu.vector_store %arg13[%c10, %c0_49], %138 {strides = array<i32>} : memref<16x32xf32, #tpu.memory_space<vmem>>, vector<2x32xf32>,
    %141 = vector.extract_strided_slice %15 {offsets = [6, 0], sizes = [2, 128], strides = [1, 1]} : vector<16x128xf32> to vector<2x128xf32>
    %cst_50 = arith.constant dense<0.000000e+00> : vector<2x128xf32>
    %142 = tpu.matmul %123, %10, %cst_50 {dimension_numbers = #tpu.dot_dimension_numbers<[1], [0], [0], [1], [0, 0, 1, 1], [], []>} : vector<2x32xf32>, vector<32x128xf32>, vector<2x128xf32> -> vector<2x128xf32>
    %143 = arith.addf %141, %142 : vector<2x128xf32>
    %144 = vector.extract_strided_slice %18 {offsets = [8, 0], sizes = [2, 128], strides = [1, 1]} : vector<16x128xf32> to vector<2x128xf32>
    %cst_51 = arith.constant dense<0.000000e+00> : vector<2x128xf32>
    %145 = tpu.matmul %138, %12, %cst_51 {dimension_numbers = #tpu.dot_dimension_numbers<[1], [0], [0], [1], [0, 0, 1, 1], [], []>} : vector<2x32xf32>, vector<32x128xf32>, vector<2x128xf32> -> vector<2x128xf32>
    %146 = arith.addf %144, %145 : vector<2x128xf32>
    %147 = arith.negf %143 : vector<2x128xf32>
    %148 = math.exp %147 : vector<2x128xf32>
    %cst_52 = arith.constant 1.000000e+00 : f32
    %149 = vector.broadcast %cst_52 : f32 to vector<2x128xf32>
    %150 = arith.addf %149, %148 : vector<2x128xf32>
    %151 = arith.divf %149, %150 : vector<2x128xf32>
    %152 = math.tanh %143 : vector<2x128xf32>
    %153 = vector.extract_strided_slice %151 {offsets = [0, 0], sizes = [2, 32], strides = [1, 1]} : vector<2x128xf32> to vector<2x32xf32>
    %154 = vector.extract_strided_slice %151 {offsets = [0, 32], sizes = [2, 32], strides = [1, 1]} : vector<2x128xf32> to vector<2x32xf32>
    %155 = vector.extract_strided_slice %152 {offsets = [0, 64], sizes = [2, 32], strides = [1, 1]} : vector<2x128xf32> to vector<2x32xf32>
    %156 = vector.extract_strided_slice %151 {offsets = [0, 96], sizes = [2, 32], strides = [1, 1]} : vector<2x128xf32> to vector<2x32xf32>
    %157 = arith.mulf %154, %121 : vector<2x32xf32>
    %158 = arith.mulf %153, %155 : vector<2x32xf32>
    %159 = arith.addf %157, %158 : vector<2x32xf32>
    %160 = math.tanh %159 : vector<2x32xf32>
    %161 = arith.mulf %156, %160 : vector<2x32xf32>
    %162 = arith.negf %146 : vector<2x128xf32>
    %163 = math.exp %162 : vector<2x128xf32>
    %cst_53 = arith.constant 1.000000e+00 : f32
    %164 = vector.broadcast %cst_53 : f32 to vector<2x128xf32>
    %165 = arith.addf %164, %163 : vector<2x128xf32>
    %166 = arith.divf %164, %165 : vector<2x128xf32>
    %167 = math.tanh %146 : vector<2x128xf32>
    %168 = vector.extract_strided_slice %166 {offsets = [0, 0], sizes = [2, 32], strides = [1, 1]} : vector<2x128xf32> to vector<2x32xf32>
    %169 = vector.extract_strided_slice %166 {offsets = [0, 32], sizes = [2, 32], strides = [1, 1]} : vector<2x128xf32> to vector<2x32xf32>
    %170 = vector.extract_strided_slice %167 {offsets = [0, 64], sizes = [2, 32], strides = [1, 1]} : vector<2x128xf32> to vector<2x32xf32>
    %171 = vector.extract_strided_slice %166 {offsets = [0, 96], sizes = [2, 32], strides = [1, 1]} : vector<2x128xf32> to vector<2x32xf32>
    %172 = arith.mulf %169, %136 : vector<2x32xf32>
    %173 = arith.mulf %168, %170 : vector<2x32xf32>
    %174 = arith.addf %172, %173 : vector<2x32xf32>
    %175 = math.tanh %174 : vector<2x32xf32>
    %176 = arith.mulf %171, %175 : vector<2x32xf32>
    %c6 = arith.constant 6 : index
    %c0_54 = arith.constant 0 : index
    %177 = vector.load %arg12[%c6, %c0_54] : memref<16x32xf32, #tpu.memory_space<vmem>>, vector<2x32xf32>
    tpu.vector_store %arg12[%c6, %c0_54], %161 {strides = array<i32>} : memref<16x32xf32, #tpu.memory_space<vmem>>, vector<2x32xf32>,
    %c8 = arith.constant 8 : index
    %c0_55 = arith.constant 0 : index
    %178 = vector.load %arg13[%c8, %c0_55] : memref<16x32xf32, #tpu.memory_space<vmem>>, vector<2x32xf32>
    tpu.vector_store %arg13[%c8, %c0_55], %176 {strides = array<i32>} : memref<16x32xf32, #tpu.memory_space<vmem>>, vector<2x32xf32>,
    %179 = vector.extract_strided_slice %15 {offsets = [8, 0], sizes = [2, 128], strides = [1, 1]} : vector<16x128xf32> to vector<2x128xf32>
    %cst_56 = arith.constant dense<0.000000e+00> : vector<2x128xf32>
    %180 = tpu.matmul %161, %10, %cst_56 {dimension_numbers = #tpu.dot_dimension_numbers<[1], [0], [0], [1], [0, 0, 1, 1], [], []>} : vector<2x32xf32>, vector<32x128xf32>, vector<2x128xf32> -> vector<2x128xf32>
    %181 = arith.addf %179, %180 : vector<2x128xf32>
    %182 = vector.extract_strided_slice %18 {offsets = [6, 0], sizes = [2, 128], strides = [1, 1]} : vector<16x128xf32> to vector<2x128xf32>
    %cst_57 = arith.constant dense<0.000000e+00> : vector<2x128xf32>
    %183 = tpu.matmul %176, %12, %cst_57 {dimension_numbers = #tpu.dot_dimension_numbers<[1], [0], [0], [1], [0, 0, 1, 1], [], []>} : vector<2x32xf32>, vector<32x128xf32>, vector<2x128xf32> -> vector<2x128xf32>
    %184 = arith.addf %182, %183 : vector<2x128xf32>
    %185 = arith.negf %181 : vector<2x128xf32>
    %186 = math.exp %185 : vector<2x128xf32>
    %cst_58 = arith.constant 1.000000e+00 : f32
    %187 = vector.broadcast %cst_58 : f32 to vector<2x128xf32>
    %188 = arith.addf %187, %186 : vector<2x128xf32>
    %189 = arith.divf %187, %188 : vector<2x128xf32>
    %190 = math.tanh %181 : vector<2x128xf32>
    %191 = vector.extract_strided_slice %189 {offsets = [0, 0], sizes = [2, 32], strides = [1, 1]} : vector<2x128xf32> to vector<2x32xf32>
    %192 = vector.extract_strided_slice %189 {offsets = [0, 32], sizes = [2, 32], strides = [1, 1]} : vector<2x128xf32> to vector<2x32xf32>
    %193 = vector.extract_strided_slice %190 {offsets = [0, 64], sizes = [2, 32], strides = [1, 1]} : vector<2x128xf32> to vector<2x32xf32>
    %194 = vector.extract_strided_slice %189 {offsets = [0, 96], sizes = [2, 32], strides = [1, 1]} : vector<2x128xf32> to vector<2x32xf32>
    %195 = arith.mulf %192, %159 : vector<2x32xf32>
    %196 = arith.mulf %191, %193 : vector<2x32xf32>
    %197 = arith.addf %195, %196 : vector<2x32xf32>
    %198 = math.tanh %197 : vector<2x32xf32>
    %199 = arith.mulf %194, %198 : vector<2x32xf32>
    %200 = arith.negf %184 : vector<2x128xf32>
    %201 = math.exp %200 : vector<2x128xf32>
    %cst_59 = arith.constant 1.000000e+00 : f32
    %202 = vector.broadcast %cst_59 : f32 to vector<2x128xf32>
    %203 = arith.addf %202, %201 : vector<2x128xf32>
    %204 = arith.divf %202, %203 : vector<2x128xf32>
    %205 = math.tanh %184 : vector<2x128xf32>
    %206 = vector.extract_strided_slice %204 {offsets = [0, 0], sizes = [2, 32], strides = [1, 1]} : vector<2x128xf32> to vector<2x32xf32>
    %207 = vector.extract_strided_slice %204 {offsets = [0, 32], sizes = [2, 32], strides = [1, 1]} : vector<2x128xf32> to vector<2x32xf32>
    %208 = vector.extract_strided_slice %205 {offsets = [0, 64], sizes = [2, 32], strides = [1, 1]} : vector<2x128xf32> to vector<2x32xf32>
    %209 = vector.extract_strided_slice %204 {offsets = [0, 96], sizes = [2, 32], strides = [1, 1]} : vector<2x128xf32> to vector<2x32xf32>
    %210 = arith.mulf %207, %174 : vector<2x32xf32>
    %211 = arith.mulf %206, %208 : vector<2x32xf32>
    %212 = arith.addf %210, %211 : vector<2x32xf32>
    %213 = math.tanh %212 : vector<2x32xf32>
    %214 = arith.mulf %209, %213 : vector<2x32xf32>
    %c8_60 = arith.constant 8 : index
    %c0_61 = arith.constant 0 : index
    %215 = vector.load %arg12[%c8_60, %c0_61] : memref<16x32xf32, #tpu.memory_space<vmem>>, vector<2x32xf32>
    tpu.vector_store %arg12[%c8_60, %c0_61], %199 {strides = array<i32>} : memref<16x32xf32, #tpu.memory_space<vmem>>, vector<2x32xf32>,
    %c6_62 = arith.constant 6 : index
    %c0_63 = arith.constant 0 : index
    %216 = vector.load %arg13[%c6_62, %c0_63] : memref<16x32xf32, #tpu.memory_space<vmem>>, vector<2x32xf32>
    tpu.vector_store %arg13[%c6_62, %c0_63], %214 {strides = array<i32>} : memref<16x32xf32, #tpu.memory_space<vmem>>, vector<2x32xf32>,
    %217 = vector.extract_strided_slice %15 {offsets = [10, 0], sizes = [2, 128], strides = [1, 1]} : vector<16x128xf32> to vector<2x128xf32>
    %cst_64 = arith.constant dense<0.000000e+00> : vector<2x128xf32>
    %218 = tpu.matmul %199, %10, %cst_64 {dimension_numbers = #tpu.dot_dimension_numbers<[1], [0], [0], [1], [0, 0, 1, 1], [], []>} : vector<2x32xf32>, vector<32x128xf32>, vector<2x128xf32> -> vector<2x128xf32>
    %219 = arith.addf %217, %218 : vector<2x128xf32>
    %220 = vector.extract_strided_slice %18 {offsets = [4, 0], sizes = [2, 128], strides = [1, 1]} : vector<16x128xf32> to vector<2x128xf32>
    %cst_65 = arith.constant dense<0.000000e+00> : vector<2x128xf32>
    %221 = tpu.matmul %214, %12, %cst_65 {dimension_numbers = #tpu.dot_dimension_numbers<[1], [0], [0], [1], [0, 0, 1, 1], [], []>} : vector<2x32xf32>, vector<32x128xf32>, vector<2x128xf32> -> vector<2x128xf32>
    %222 = arith.addf %220, %221 : vector<2x128xf32>
    %223 = arith.negf %219 : vector<2x128xf32>
    %224 = math.exp %223 : vector<2x128xf32>
    %cst_66 = arith.constant 1.000000e+00 : f32
    %225 = vector.broadcast %cst_66 : f32 to vector<2x128xf32>
    %226 = arith.addf %225, %224 : vector<2x128xf32>
    %227 = arith.divf %225, %226 : vector<2x128xf32>
    %228 = math.tanh %219 : vector<2x128xf32>
    %229 = vector.extract_strided_slice %227 {offsets = [0, 0], sizes = [2, 32], strides = [1, 1]} : vector<2x128xf32> to vector<2x32xf32>
    %230 = vector.extract_strided_slice %227 {offsets = [0, 32], sizes = [2, 32], strides = [1, 1]} : vector<2x128xf32> to vector<2x32xf32>
    %231 = vector.extract_strided_slice %228 {offsets = [0, 64], sizes = [2, 32], strides = [1, 1]} : vector<2x128xf32> to vector<2x32xf32>
    %232 = vector.extract_strided_slice %227 {offsets = [0, 96], sizes = [2, 32], strides = [1, 1]} : vector<2x128xf32> to vector<2x32xf32>
    %233 = arith.mulf %230, %197 : vector<2x32xf32>
    %234 = arith.mulf %229, %231 : vector<2x32xf32>
    %235 = arith.addf %233, %234 : vector<2x32xf32>
    %236 = math.tanh %235 : vector<2x32xf32>
    %237 = arith.mulf %232, %236 : vector<2x32xf32>
    %238 = arith.negf %222 : vector<2x128xf32>
    %239 = math.exp %238 : vector<2x128xf32>
    %cst_67 = arith.constant 1.000000e+00 : f32
    %240 = vector.broadcast %cst_67 : f32 to vector<2x128xf32>
    %241 = arith.addf %240, %239 : vector<2x128xf32>
    %242 = arith.divf %240, %241 : vector<2x128xf32>
    %243 = math.tanh %222 : vector<2x128xf32>
    %244 = vector.extract_strided_slice %242 {offsets = [0, 0], sizes = [2, 32], strides = [1, 1]} : vector<2x128xf32> to vector<2x32xf32>
    %245 = vector.extract_strided_slice %242 {offsets = [0, 32], sizes = [2, 32], strides = [1, 1]} : vector<2x128xf32> to vector<2x32xf32>
    %246 = vector.extract_strided_slice %243 {offsets = [0, 64], sizes = [2, 32], strides = [1, 1]} : vector<2x128xf32> to vector<2x32xf32>
    %247 = vector.extract_strided_slice %242 {offsets = [0, 96], sizes = [2, 32], strides = [1, 1]} : vector<2x128xf32> to vector<2x32xf32>
    %248 = arith.mulf %245, %212 : vector<2x32xf32>
    %249 = arith.mulf %244, %246 : vector<2x32xf32>
    %250 = arith.addf %248, %249 : vector<2x32xf32>
    %251 = math.tanh %250 : vector<2x32xf32>
    %252 = arith.mulf %247, %251 : vector<2x32xf32>
    %c10_68 = arith.constant 10 : index
    %c0_69 = arith.constant 0 : index
    %253 = vector.load %arg12[%c10_68, %c0_69] : memref<16x32xf32, #tpu.memory_space<vmem>>, vector<2x32xf32>
    tpu.vector_store %arg12[%c10_68, %c0_69], %237 {strides = array<i32>} : memref<16x32xf32, #tpu.memory_space<vmem>>, vector<2x32xf32>,
    %c4_70 = arith.constant 4 : index
    %c0_71 = arith.constant 0 : index
    %254 = vector.load %arg13[%c4_70, %c0_71] : memref<16x32xf32, #tpu.memory_space<vmem>>, vector<2x32xf32>
    tpu.vector_store %arg13[%c4_70, %c0_71], %252 {strides = array<i32>} : memref<16x32xf32, #tpu.memory_space<vmem>>, vector<2x32xf32>,
    %255 = vector.extract_strided_slice %15 {offsets = [12, 0], sizes = [2, 128], strides = [1, 1]} : vector<16x128xf32> to vector<2x128xf32>
    %cst_72 = arith.constant dense<0.000000e+00> : vector<2x128xf32>
    %256 = tpu.matmul %237, %10, %cst_72 {dimension_numbers = #tpu.dot_dimension_numbers<[1], [0], [0], [1], [0, 0, 1, 1], [], []>} : vector<2x32xf32>, vector<32x128xf32>, vector<2x128xf32> -> vector<2x128xf32>
    %257 = arith.addf %255, %256 : vector<2x128xf32>
    %258 = vector.extract_strided_slice %18 {offsets = [2, 0], sizes = [2, 128], strides = [1, 1]} : vector<16x128xf32> to vector<2x128xf32>
    %cst_73 = arith.constant dense<0.000000e+00> : vector<2x128xf32>
    %259 = tpu.matmul %252, %12, %cst_73 {dimension_numbers = #tpu.dot_dimension_numbers<[1], [0], [0], [1], [0, 0, 1, 1], [], []>} : vector<2x32xf32>, vector<32x128xf32>, vector<2x128xf32> -> vector<2x128xf32>
    %260 = arith.addf %258, %259 : vector<2x128xf32>
    %261 = arith.negf %257 : vector<2x128xf32>
    %262 = math.exp %261 : vector<2x128xf32>
    %cst_74 = arith.constant 1.000000e+00 : f32
    %263 = vector.broadcast %cst_74 : f32 to vector<2x128xf32>
    %264 = arith.addf %263, %262 : vector<2x128xf32>
    %265 = arith.divf %263, %264 : vector<2x128xf32>
    %266 = math.tanh %257 : vector<2x128xf32>
    %267 = vector.extract_strided_slice %265 {offsets = [0, 0], sizes = [2, 32], strides = [1, 1]} : vector<2x128xf32> to vector<2x32xf32>
    %268 = vector.extract_strided_slice %265 {offsets = [0, 32], sizes = [2, 32], strides = [1, 1]} : vector<2x128xf32> to vector<2x32xf32>
    %269 = vector.extract_strided_slice %266 {offsets = [0, 64], sizes = [2, 32], strides = [1, 1]} : vector<2x128xf32> to vector<2x32xf32>
    %270 = vector.extract_strided_slice %265 {offsets = [0, 96], sizes = [2, 32], strides = [1, 1]} : vector<2x128xf32> to vector<2x32xf32>
    %271 = arith.mulf %268, %235 : vector<2x32xf32>
    %272 = arith.mulf %267, %269 : vector<2x32xf32>
    %273 = arith.addf %271, %272 : vector<2x32xf32>
    %274 = math.tanh %273 : vector<2x32xf32>
    %275 = arith.mulf %270, %274 : vector<2x32xf32>
    %276 = arith.negf %260 : vector<2x128xf32>
    %277 = math.exp %276 : vector<2x128xf32>
    %cst_75 = arith.constant 1.000000e+00 : f32
    %278 = vector.broadcast %cst_75 : f32 to vector<2x128xf32>
    %279 = arith.addf %278, %277 : vector<2x128xf32>
    %280 = arith.divf %278, %279 : vector<2x128xf32>
    %281 = math.tanh %260 : vector<2x128xf32>
    %282 = vector.extract_strided_slice %280 {offsets = [0, 0], sizes = [2, 32], strides = [1, 1]} : vector<2x128xf32> to vector<2x32xf32>
    %283 = vector.extract_strided_slice %280 {offsets = [0, 32], sizes = [2, 32], strides = [1, 1]} : vector<2x128xf32> to vector<2x32xf32>
    %284 = vector.extract_strided_slice %281 {offsets = [0, 64], sizes = [2, 32], strides = [1, 1]} : vector<2x128xf32> to vector<2x32xf32>
    %285 = vector.extract_strided_slice %280 {offsets = [0, 96], sizes = [2, 32], strides = [1, 1]} : vector<2x128xf32> to vector<2x32xf32>
    %286 = arith.mulf %283, %250 : vector<2x32xf32>
    %287 = arith.mulf %282, %284 : vector<2x32xf32>
    %288 = arith.addf %286, %287 : vector<2x32xf32>
    %289 = math.tanh %288 : vector<2x32xf32>
    %290 = arith.mulf %285, %289 : vector<2x32xf32>
    %c12_76 = arith.constant 12 : index
    %c0_77 = arith.constant 0 : index
    %291 = vector.load %arg12[%c12_76, %c0_77] : memref<16x32xf32, #tpu.memory_space<vmem>>, vector<2x32xf32>
    tpu.vector_store %arg12[%c12_76, %c0_77], %275 {strides = array<i32>} : memref<16x32xf32, #tpu.memory_space<vmem>>, vector<2x32xf32>,
    %c2_78 = arith.constant 2 : index
    %c0_79 = arith.constant 0 : index
    %292 = vector.load %arg13[%c2_78, %c0_79] : memref<16x32xf32, #tpu.memory_space<vmem>>, vector<2x32xf32>
    tpu.vector_store %arg13[%c2_78, %c0_79], %290 {strides = array<i32>} : memref<16x32xf32, #tpu.memory_space<vmem>>, vector<2x32xf32>,
    %293 = vector.extract_strided_slice %15 {offsets = [14, 0], sizes = [2, 128], strides = [1, 1]} : vector<16x128xf32> to vector<2x128xf32>
    %cst_80 = arith.constant dense<0.000000e+00> : vector<2x128xf32>
    %294 = tpu.matmul %275, %10, %cst_80 {dimension_numbers = #tpu.dot_dimension_numbers<[1], [0], [0], [1], [0, 0, 1, 1], [], []>} : vector<2x32xf32>, vector<32x128xf32>, vector<2x128xf32> -> vector<2x128xf32>
    %295 = arith.addf %293, %294 : vector<2x128xf32>
    %296 = vector.extract_strided_slice %18 {offsets = [0, 0], sizes = [2, 128], strides = [1, 1]} : vector<16x128xf32> to vector<2x128xf32>
    %cst_81 = arith.constant dense<0.000000e+00> : vector<2x128xf32>
    %297 = tpu.matmul %290, %12, %cst_81 {dimension_numbers = #tpu.dot_dimension_numbers<[1], [0], [0], [1], [0, 0, 1, 1], [], []>} : vector<2x32xf32>, vector<32x128xf32>, vector<2x128xf32> -> vector<2x128xf32>
    %298 = arith.addf %296, %297 : vector<2x128xf32>
    %299 = arith.negf %295 : vector<2x128xf32>
    %300 = math.exp %299 : vector<2x128xf32>
    %cst_82 = arith.constant 1.000000e+00 : f32
    %301 = vector.broadcast %cst_82 : f32 to vector<2x128xf32>
    %302 = arith.addf %301, %300 : vector<2x128xf32>
    %303 = arith.divf %301, %302 : vector<2x128xf32>
    %304 = math.tanh %295 : vector<2x128xf32>
    %305 = vector.extract_strided_slice %303 {offsets = [0, 0], sizes = [2, 32], strides = [1, 1]} : vector<2x128xf32> to vector<2x32xf32>
    %306 = vector.extract_strided_slice %303 {offsets = [0, 32], sizes = [2, 32], strides = [1, 1]} : vector<2x128xf32> to vector<2x32xf32>
    %307 = vector.extract_strided_slice %304 {offsets = [0, 64], sizes = [2, 32], strides = [1, 1]} : vector<2x128xf32> to vector<2x32xf32>
    %308 = vector.extract_strided_slice %303 {offsets = [0, 96], sizes = [2, 32], strides = [1, 1]} : vector<2x128xf32> to vector<2x32xf32>
    %309 = arith.mulf %306, %273 : vector<2x32xf32>
    %310 = arith.mulf %305, %307 : vector<2x32xf32>
    %311 = arith.addf %309, %310 : vector<2x32xf32>
    %312 = math.tanh %311 : vector<2x32xf32>
    %313 = arith.mulf %308, %312 : vector<2x32xf32>
    %314 = arith.negf %298 : vector<2x128xf32>
    %315 = math.exp %314 : vector<2x128xf32>
    %cst_83 = arith.constant 1.000000e+00 : f32
    %316 = vector.broadcast %cst_83 : f32 to vector<2x128xf32>
    %317 = arith.addf %316, %315 : vector<2x128xf32>
    %318 = arith.divf %316, %317 : vector<2x128xf32>
    %319 = math.tanh %298 : vector<2x128xf32>
    %320 = vector.extract_strided_slice %318 {offsets = [0, 0], sizes = [2, 32], strides = [1, 1]} : vector<2x128xf32> to vector<2x32xf32>
    %321 = vector.extract_strided_slice %318 {offsets = [0, 32], sizes = [2, 32], strides = [1, 1]} : vector<2x128xf32> to vector<2x32xf32>
    %322 = vector.extract_strided_slice %319 {offsets = [0, 64], sizes = [2, 32], strides = [1, 1]} : vector<2x128xf32> to vector<2x32xf32>
    %323 = vector.extract_strided_slice %318 {offsets = [0, 96], sizes = [2, 32], strides = [1, 1]} : vector<2x128xf32> to vector<2x32xf32>
    %324 = arith.mulf %321, %288 : vector<2x32xf32>
    %325 = arith.mulf %320, %322 : vector<2x32xf32>
    %326 = arith.addf %324, %325 : vector<2x32xf32>
    %327 = math.tanh %326 : vector<2x32xf32>
    %328 = arith.mulf %323, %327 : vector<2x32xf32>
    %c14_84 = arith.constant 14 : index
    %c0_85 = arith.constant 0 : index
    %329 = vector.load %arg12[%c14_84, %c0_85] : memref<16x32xf32, #tpu.memory_space<vmem>>, vector<2x32xf32>
    tpu.vector_store %arg12[%c14_84, %c0_85], %313 {strides = array<i32>} : memref<16x32xf32, #tpu.memory_space<vmem>>, vector<2x32xf32>,
    %c0_86 = arith.constant 0 : index
    %c0_87 = arith.constant 0 : index
    %330 = vector.load %arg13[%c0_86, %c0_87] : memref<16x32xf32, #tpu.memory_space<vmem>>, vector<2x32xf32>
    tpu.vector_store %arg13[%c0_86, %c0_87], %328 {strides = array<i32>} : memref<16x32xf32, #tpu.memory_space<vmem>>, vector<2x32xf32>,
    %c0_88 = arith.constant 0 : index
    %c0_89 = arith.constant 0 : index
    %331 = vector.load %arg12[%c0_88, %c0_89] : memref<16x32xf32, #tpu.memory_space<vmem>>, vector<16x32xf32>
    %c0_90 = arith.constant 0 : index
    %c0_91 = arith.constant 0 : index
    %332 = vector.load %arg13[%c0_90, %c0_91] : memref<16x32xf32, #tpu.memory_space<vmem>>, vector<16x32xf32>
    %c0_92 = arith.constant 0 : index
    %c0_93 = arith.constant 0 : index
    %c0_94 = arith.constant 0 : index
    %333 = vector.load %arg4[%c0_92, %c0_93, %c0_94] : memref<2x64x128xf32, #tpu.memory_space<vmem>>, vector<1x64x128xf32>
    %334 = vector.shape_cast %333 : vector<1x64x128xf32> to vector<64x128xf32>
    %c1_95 = arith.constant 1 : index
    %c0_96 = arith.constant 0 : index
    %c0_97 = arith.constant 0 : index
    %335 = vector.load %arg4[%c1_95, %c0_96, %c0_97] : memref<2x64x128xf32, #tpu.memory_space<vmem>>, vector<1x64x128xf32>
    %336 = vector.shape_cast %335 : vector<1x64x128xf32> to vector<64x128xf32>
    %c0_98 = arith.constant 0 : index
    %c0_99 = arith.constant 0 : index
    %c0_100 = arith.constant 0 : index
    %337 = vector.load %arg6[%c0_98, %c0_99, %c0_100] : memref<2x1x128xf32, #tpu.memory_space<vmem>>, vector<1x1x128xf32>
    %338 = vector.shape_cast %337 : vector<1x1x128xf32> to vector<1x128xf32>
    %c1_101 = arith.constant 1 : index
    %c0_102 = arith.constant 0 : index
    %c0_103 = arith.constant 0 : index
    %339 = vector.load %arg6[%c1_101, %c0_102, %c0_103] : memref<2x1x128xf32, #tpu.memory_space<vmem>>, vector<1x1x128xf32>
    %340 = vector.shape_cast %339 : vector<1x1x128xf32> to vector<1x128xf32>
    %c0_104 = arith.constant 0 : index
    %c0_105 = arith.constant 0 : index
    %c0_106 = arith.constant 0 : index
    %341 = vector.load %arg5[%c0_104, %c0_105, %c0_106] : memref<2x32x128xf32, #tpu.memory_space<vmem>>, vector<1x32x128xf32>
    %342 = vector.shape_cast %341 : vector<1x32x128xf32> to vector<32x128xf32>
    %c1_107 = arith.constant 1 : index
    %c0_108 = arith.constant 0 : index
    %c0_109 = arith.constant 0 : index
    %343 = vector.load %arg5[%c1_107, %c0_108, %c0_109] : memref<2x32x128xf32, #tpu.memory_space<vmem>>, vector<1x32x128xf32>
    %344 = vector.shape_cast %343 : vector<1x32x128xf32> to vector<32x128xf32>
    %345 = vector.extract_strided_slice %334 {offsets = [0, 0], sizes = [32, 128], strides = [1, 1]} : vector<64x128xf32> to vector<32x128xf32>
    %cst_110 = arith.constant dense<0.000000e+00> : vector<16x128xf32>
    %346 = tpu.matmul %331, %345, %cst_110 {dimension_numbers = #tpu.dot_dimension_numbers<[1], [0], [0], [1], [0, 0, 1, 1], [], []>} : vector<16x32xf32>, vector<32x128xf32>, vector<16x128xf32> -> vector<16x128xf32>
    %347 = vector.extract_strided_slice %334 {offsets = [32, 0], sizes = [32, 128], strides = [1, 1]} : vector<64x128xf32> to vector<32x128xf32>
    %cst_111 = arith.constant dense<0.000000e+00> : vector<16x128xf32>
    %348 = tpu.matmul %332, %347, %cst_111 {dimension_numbers = #tpu.dot_dimension_numbers<[1], [0], [0], [1], [0, 0, 1, 1], [], []>} : vector<16x32xf32>, vector<32x128xf32>, vector<16x128xf32> -> vector<16x128xf32>
    %349 = arith.addf %346, %348 : vector<16x128xf32>
    %350 = vector.broadcast %338 : vector<1x128xf32> to vector<16x128xf32>
    %351 = arith.addf %349, %350 : vector<16x128xf32>
    %352 = vector.extract_strided_slice %331 {offsets = [14, 0], sizes = [2, 32], strides = [1, 1]} : vector<16x32xf32> to vector<2x32xf32>
    %353 = vector.extract_strided_slice %332 {offsets = [14, 0], sizes = [2, 32], strides = [1, 1]} : vector<16x32xf32> to vector<2x32xf32>
    %354 = vector.extract_strided_slice %336 {offsets = [0, 0], sizes = [32, 128], strides = [1, 1]} : vector<64x128xf32> to vector<32x128xf32>
    %cst_112 = arith.constant dense<0.000000e+00> : vector<2x128xf32>
    %355 = tpu.matmul %352, %354, %cst_112 {dimension_numbers = #tpu.dot_dimension_numbers<[1], [0], [0], [1], [0, 0, 1, 1], [], []>} : vector<2x32xf32>, vector<32x128xf32>, vector<2x128xf32> -> vector<2x128xf32>
    %356 = vector.extract_strided_slice %336 {offsets = [32, 0], sizes = [32, 128], strides = [1, 1]} : vector<64x128xf32> to vector<32x128xf32>
    %cst_113 = arith.constant dense<0.000000e+00> : vector<2x128xf32>
    %357 = tpu.matmul %353, %356, %cst_113 {dimension_numbers = #tpu.dot_dimension_numbers<[1], [0], [0], [1], [0, 0, 1, 1], [], []>} : vector<2x32xf32>, vector<32x128xf32>, vector<2x128xf32> -> vector<2x128xf32>
    %358 = arith.addf %355, %357 : vector<2x128xf32>
    %359 = vector.broadcast %340 : vector<1x128xf32> to vector<2x128xf32>
    %360 = arith.addf %358, %359 : vector<2x128xf32>
    %c2_114 = arith.constant 2 : index
    %c0_115 = arith.constant 0 : index
    %c0_116 = arith.constant 0 : index
    %361 = vector.load %arg7[%c2_114, %c0_115, %c0_116] : memref<4x2x32xf32, #tpu.memory_space<vmem>>, vector<1x2x32xf32>
    %362 = vector.shape_cast %361 : vector<1x2x32xf32> to vector<2x32xf32>
    %c2_117 = arith.constant 2 : index
    %c0_118 = arith.constant 0 : index
    %c0_119 = arith.constant 0 : index
    %363 = vector.load %arg8[%c2_117, %c0_118, %c0_119] : memref<4x2x32xf32, #tpu.memory_space<vmem>>, vector<1x2x32xf32>
    %364 = vector.shape_cast %363 : vector<1x2x32xf32> to vector<2x32xf32>
    %c3 = arith.constant 3 : index
    %c0_120 = arith.constant 0 : index
    %c0_121 = arith.constant 0 : index
    %365 = vector.load %arg7[%c3, %c0_120, %c0_121] : memref<4x2x32xf32, #tpu.memory_space<vmem>>, vector<1x2x32xf32>
    %366 = vector.shape_cast %365 : vector<1x2x32xf32> to vector<2x32xf32>
    %c3_122 = arith.constant 3 : index
    %c0_123 = arith.constant 0 : index
    %c0_124 = arith.constant 0 : index
    %367 = vector.load %arg8[%c3_122, %c0_123, %c0_124] : memref<4x2x32xf32, #tpu.memory_space<vmem>>, vector<1x2x32xf32>
    %368 = vector.shape_cast %367 : vector<1x2x32xf32> to vector<2x32xf32>
    %369 = vector.extract_strided_slice %351 {offsets = [0, 0], sizes = [2, 128], strides = [1, 1]} : vector<16x128xf32> to vector<2x128xf32>
    %cst_125 = arith.constant dense<0.000000e+00> : vector<2x128xf32>
    %370 = tpu.matmul %362, %342, %cst_125 {dimension_numbers = #tpu.dot_dimension_numbers<[1], [0], [0], [1], [0, 0, 1, 1], [], []>} : vector<2x32xf32>, vector<32x128xf32>, vector<2x128xf32> -> vector<2x128xf32>
    %371 = arith.addf %369, %370 : vector<2x128xf32>
    %372 = arith.negf %371 : vector<2x128xf32>
    %373 = math.exp %372 : vector<2x128xf32>
    %cst_126 = arith.constant 1.000000e+00 : f32
    %374 = vector.broadcast %cst_126 : f32 to vector<2x128xf32>
    %375 = arith.addf %374, %373 : vector<2x128xf32>
    %376 = arith.divf %374, %375 : vector<2x128xf32>
    %377 = math.tanh %371 : vector<2x128xf32>
    %378 = vector.extract_strided_slice %376 {offsets = [0, 0], sizes = [2, 32], strides = [1, 1]} : vector<2x128xf32> to vector<2x32xf32>
    %379 = vector.extract_strided_slice %376 {offsets = [0, 32], sizes = [2, 32], strides = [1, 1]} : vector<2x128xf32> to vector<2x32xf32>
    %380 = vector.extract_strided_slice %377 {offsets = [0, 64], sizes = [2, 32], strides = [1, 1]} : vector<2x128xf32> to vector<2x32xf32>
    %381 = vector.extract_strided_slice %376 {offsets = [0, 96], sizes = [2, 32], strides = [1, 1]} : vector<2x128xf32> to vector<2x32xf32>
    %382 = arith.mulf %379, %364 : vector<2x32xf32>
    %383 = arith.mulf %378, %380 : vector<2x32xf32>
    %384 = arith.addf %382, %383 : vector<2x32xf32>
    %385 = math.tanh %384 : vector<2x32xf32>
    %386 = arith.mulf %381, %385 : vector<2x32xf32>
    %387 = vector.extract_strided_slice %351 {offsets = [2, 0], sizes = [2, 128], strides = [1, 1]} : vector<16x128xf32> to vector<2x128xf32>
    %cst_127 = arith.constant dense<0.000000e+00> : vector<2x128xf32>
    %388 = tpu.matmul %386, %342, %cst_127 {dimension_numbers = #tpu.dot_dimension_numbers<[1], [0], [0], [1], [0, 0, 1, 1], [], []>} : vector<2x32xf32>, vector<32x128xf32>, vector<2x128xf32> -> vector<2x128xf32>
    %389 = arith.addf %387, %388 : vector<2x128xf32>
    %390 = arith.negf %389 : vector<2x128xf32>
    %391 = math.exp %390 : vector<2x128xf32>
    %cst_128 = arith.constant 1.000000e+00 : f32
    %392 = vector.broadcast %cst_128 : f32 to vector<2x128xf32>
    %393 = arith.addf %392, %391 : vector<2x128xf32>
    %394 = arith.divf %392, %393 : vector<2x128xf32>
    %395 = math.tanh %389 : vector<2x128xf32>
    %396 = vector.extract_strided_slice %394 {offsets = [0, 0], sizes = [2, 32], strides = [1, 1]} : vector<2x128xf32> to vector<2x32xf32>
    %397 = vector.extract_strided_slice %394 {offsets = [0, 32], sizes = [2, 32], strides = [1, 1]} : vector<2x128xf32> to vector<2x32xf32>
    %398 = vector.extract_strided_slice %395 {offsets = [0, 64], sizes = [2, 32], strides = [1, 1]} : vector<2x128xf32> to vector<2x32xf32>
    %399 = vector.extract_strided_slice %394 {offsets = [0, 96], sizes = [2, 32], strides = [1, 1]} : vector<2x128xf32> to vector<2x32xf32>
    %400 = arith.mulf %397, %384 : vector<2x32xf32>
    %401 = arith.mulf %396, %398 : vector<2x32xf32>
    %402 = arith.addf %400, %401 : vector<2x32xf32>
    %403 = math.tanh %402 : vector<2x32xf32>
    %404 = arith.mulf %399, %403 : vector<2x32xf32>
    %405 = vector.extract_strided_slice %351 {offsets = [4, 0], sizes = [2, 128], strides = [1, 1]} : vector<16x128xf32> to vector<2x128xf32>
    %cst_129 = arith.constant dense<0.000000e+00> : vector<2x128xf32>
    %406 = tpu.matmul %404, %342, %cst_129 {dimension_numbers = #tpu.dot_dimension_numbers<[1], [0], [0], [1], [0, 0, 1, 1], [], []>} : vector<2x32xf32>, vector<32x128xf32>, vector<2x128xf32> -> vector<2x128xf32>
    %407 = arith.addf %405, %406 : vector<2x128xf32>
    %408 = arith.negf %407 : vector<2x128xf32>
    %409 = math.exp %408 : vector<2x128xf32>
    %cst_130 = arith.constant 1.000000e+00 : f32
    %410 = vector.broadcast %cst_130 : f32 to vector<2x128xf32>
    %411 = arith.addf %410, %409 : vector<2x128xf32>
    %412 = arith.divf %410, %411 : vector<2x128xf32>
    %413 = math.tanh %407 : vector<2x128xf32>
    %414 = vector.extract_strided_slice %412 {offsets = [0, 0], sizes = [2, 32], strides = [1, 1]} : vector<2x128xf32> to vector<2x32xf32>
    %415 = vector.extract_strided_slice %412 {offsets = [0, 32], sizes = [2, 32], strides = [1, 1]} : vector<2x128xf32> to vector<2x32xf32>
    %416 = vector.extract_strided_slice %413 {offsets = [0, 64], sizes = [2, 32], strides = [1, 1]} : vector<2x128xf32> to vector<2x32xf32>
    %417 = vector.extract_strided_slice %412 {offsets = [0, 96], sizes = [2, 32], strides = [1, 1]} : vector<2x128xf32> to vector<2x32xf32>
    %418 = arith.mulf %415, %402 : vector<2x32xf32>
    %419 = arith.mulf %414, %416 : vector<2x32xf32>
    %420 = arith.addf %418, %419 : vector<2x32xf32>
    %421 = math.tanh %420 : vector<2x32xf32>
    %422 = arith.mulf %417, %421 : vector<2x32xf32>
    %423 = vector.extract_strided_slice %351 {offsets = [6, 0], sizes = [2, 128], strides = [1, 1]} : vector<16x128xf32> to vector<2x128xf32>
    %cst_131 = arith.constant dense<0.000000e+00> : vector<2x128xf32>
    %424 = tpu.matmul %422, %342, %cst_131 {dimension_numbers = #tpu.dot_dimension_numbers<[1], [0], [0], [1], [0, 0, 1, 1], [], []>} : vector<2x32xf32>, vector<32x128xf32>, vector<2x128xf32> -> vector<2x128xf32>
    %425 = arith.addf %423, %424 : vector<2x128xf32>
    %426 = arith.negf %425 : vector<2x128xf32>
    %427 = math.exp %426 : vector<2x128xf32>
    %cst_132 = arith.constant 1.000000e+00 : f32
    %428 = vector.broadcast %cst_132 : f32 to vector<2x128xf32>
    %429 = arith.addf %428, %427 : vector<2x128xf32>
    %430 = arith.divf %428, %429 : vector<2x128xf32>
    %431 = math.tanh %425 : vector<2x128xf32>
    %432 = vector.extract_strided_slice %430 {offsets = [0, 0], sizes = [2, 32], strides = [1, 1]} : vector<2x128xf32> to vector<2x32xf32>
    %433 = vector.extract_strided_slice %430 {offsets = [0, 32], sizes = [2, 32], strides = [1, 1]} : vector<2x128xf32> to vector<2x32xf32>
    %434 = vector.extract_strided_slice %431 {offsets = [0, 64], sizes = [2, 32], strides = [1, 1]} : vector<2x128xf32> to vector<2x32xf32>
    %435 = vector.extract_strided_slice %430 {offsets = [0, 96], sizes = [2, 32], strides = [1, 1]} : vector<2x128xf32> to vector<2x32xf32>
    %436 = arith.mulf %433, %420 : vector<2x32xf32>
    %437 = arith.mulf %432, %434 : vector<2x32xf32>
    %438 = arith.addf %436, %437 : vector<2x32xf32>
    %439 = math.tanh %438 : vector<2x32xf32>
    %440 = arith.mulf %435, %439 : vector<2x32xf32>
    %441 = vector.extract_strided_slice %351 {offsets = [8, 0], sizes = [2, 128], strides = [1, 1]} : vector<16x128xf32> to vector<2x128xf32>
    %cst_133 = arith.constant dense<0.000000e+00> : vector<2x128xf32>
    %442 = tpu.matmul %440, %342, %cst_133 {dimension_numbers = #tpu.dot_dimension_numbers<[1], [0], [0], [1], [0, 0, 1, 1], [], []>} : vector<2x32xf32>, vector<32x128xf32>, vector<2x128xf32> -> vector<2x128xf32>
    %443 = arith.addf %441, %442 : vector<2x128xf32>
    %444 = arith.negf %443 : vector<2x128xf32>
    %445 = math.exp %444 : vector<2x128xf32>
    %cst_134 = arith.constant 1.000000e+00 : f32
    %446 = vector.broadcast %cst_134 : f32 to vector<2x128xf32>
    %447 = arith.addf %446, %445 : vector<2x128xf32>
    %448 = arith.divf %446, %447 : vector<2x128xf32>
    %449 = math.tanh %443 : vector<2x128xf32>
    %450 = vector.extract_strided_slice %448 {offsets = [0, 0], sizes = [2, 32], strides = [1, 1]} : vector<2x128xf32> to vector<2x32xf32>
    %451 = vector.extract_strided_slice %448 {offsets = [0, 32], sizes = [2, 32], strides = [1, 1]} : vector<2x128xf32> to vector<2x32xf32>
    %452 = vector.extract_strided_slice %449 {offsets = [0, 64], sizes = [2, 32], strides = [1, 1]} : vector<2x128xf32> to vector<2x32xf32>
    %453 = vector.extract_strided_slice %448 {offsets = [0, 96], sizes = [2, 32], strides = [1, 1]} : vector<2x128xf32> to vector<2x32xf32>
    %454 = arith.mulf %451, %438 : vector<2x32xf32>
    %455 = arith.mulf %450, %452 : vector<2x32xf32>
    %456 = arith.addf %454, %455 : vector<2x32xf32>
    %457 = math.tanh %456 : vector<2x32xf32>
    %458 = arith.mulf %453, %457 : vector<2x32xf32>
    %459 = vector.extract_strided_slice %351 {offsets = [10, 0], sizes = [2, 128], strides = [1, 1]} : vector<16x128xf32> to vector<2x128xf32>
    %cst_135 = arith.constant dense<0.000000e+00> : vector<2x128xf32>
    %460 = tpu.matmul %458, %342, %cst_135 {dimension_numbers = #tpu.dot_dimension_numbers<[1], [0], [0], [1], [0, 0, 1, 1], [], []>} : vector<2x32xf32>, vector<32x128xf32>, vector<2x128xf32> -> vector<2x128xf32>
    %461 = arith.addf %459, %460 : vector<2x128xf32>
    %462 = arith.negf %461 : vector<2x128xf32>
    %463 = math.exp %462 : vector<2x128xf32>
    %cst_136 = arith.constant 1.000000e+00 : f32
    %464 = vector.broadcast %cst_136 : f32 to vector<2x128xf32>
    %465 = arith.addf %464, %463 : vector<2x128xf32>
    %466 = arith.divf %464, %465 : vector<2x128xf32>
    %467 = math.tanh %461 : vector<2x128xf32>
    %468 = vector.extract_strided_slice %466 {offsets = [0, 0], sizes = [2, 32], strides = [1, 1]} : vector<2x128xf32> to vector<2x32xf32>
    %469 = vector.extract_strided_slice %466 {offsets = [0, 32], sizes = [2, 32], strides = [1, 1]} : vector<2x128xf32> to vector<2x32xf32>
    %470 = vector.extract_strided_slice %467 {offsets = [0, 64], sizes = [2, 32], strides = [1, 1]} : vector<2x128xf32> to vector<2x32xf32>
    %471 = vector.extract_strided_slice %466 {offsets = [0, 96], sizes = [2, 32], strides = [1, 1]} : vector<2x128xf32> to vector<2x32xf32>
    %472 = arith.mulf %469, %456 : vector<2x32xf32>
    %473 = arith.mulf %468, %470 : vector<2x32xf32>
    %474 = arith.addf %472, %473 : vector<2x32xf32>
    %475 = math.tanh %474 : vector<2x32xf32>
    %476 = arith.mulf %471, %475 : vector<2x32xf32>
    %477 = vector.extract_strided_slice %351 {offsets = [12, 0], sizes = [2, 128], strides = [1, 1]} : vector<16x128xf32> to vector<2x128xf32>
    %cst_137 = arith.constant dense<0.000000e+00> : vector<2x128xf32>
    %478 = tpu.matmul %476, %342, %cst_137 {dimension_numbers = #tpu.dot_dimension_numbers<[1], [0], [0], [1], [0, 0, 1, 1], [], []>} : vector<2x32xf32>, vector<32x128xf32>, vector<2x128xf32> -> vector<2x128xf32>
    %479 = arith.addf %477, %478 : vector<2x128xf32>
    %480 = arith.negf %479 : vector<2x128xf32>
    %481 = math.exp %480 : vector<2x128xf32>
    %cst_138 = arith.constant 1.000000e+00 : f32
    %482 = vector.broadcast %cst_138 : f32 to vector<2x128xf32>
    %483 = arith.addf %482, %481 : vector<2x128xf32>
    %484 = arith.divf %482, %483 : vector<2x128xf32>
    %485 = math.tanh %479 : vector<2x128xf32>
    %486 = vector.extract_strided_slice %484 {offsets = [0, 0], sizes = [2, 32], strides = [1, 1]} : vector<2x128xf32> to vector<2x32xf32>
    %487 = vector.extract_strided_slice %484 {offsets = [0, 32], sizes = [2, 32], strides = [1, 1]} : vector<2x128xf32> to vector<2x32xf32>
    %488 = vector.extract_strided_slice %485 {offsets = [0, 64], sizes = [2, 32], strides = [1, 1]} : vector<2x128xf32> to vector<2x32xf32>
    %489 = vector.extract_strided_slice %484 {offsets = [0, 96], sizes = [2, 32], strides = [1, 1]} : vector<2x128xf32> to vector<2x32xf32>
    %490 = arith.mulf %487, %474 : vector<2x32xf32>
    %491 = arith.mulf %486, %488 : vector<2x32xf32>
    %492 = arith.addf %490, %491 : vector<2x32xf32>
    %493 = math.tanh %492 : vector<2x32xf32>
    %494 = arith.mulf %489, %493 : vector<2x32xf32>
    %495 = vector.extract_strided_slice %351 {offsets = [14, 0], sizes = [2, 128], strides = [1, 1]} : vector<16x128xf32> to vector<2x128xf32>
    %cst_139 = arith.constant dense<0.000000e+00> : vector<2x128xf32>
    %496 = tpu.matmul %494, %342, %cst_139 {dimension_numbers = #tpu.dot_dimension_numbers<[1], [0], [0], [1], [0, 0, 1, 1], [], []>} : vector<2x32xf32>, vector<32x128xf32>, vector<2x128xf32> -> vector<2x128xf32>
    %497 = arith.addf %495, %496 : vector<2x128xf32>
    %498 = arith.negf %497 : vector<2x128xf32>
    %499 = math.exp %498 : vector<2x128xf32>
    %cst_140 = arith.constant 1.000000e+00 : f32
    %500 = vector.broadcast %cst_140 : f32 to vector<2x128xf32>
    %501 = arith.addf %500, %499 : vector<2x128xf32>
    %502 = arith.divf %500, %501 : vector<2x128xf32>
    %503 = math.tanh %497 : vector<2x128xf32>
    %504 = vector.extract_strided_slice %502 {offsets = [0, 0], sizes = [2, 32], strides = [1, 1]} : vector<2x128xf32> to vector<2x32xf32>
    %505 = vector.extract_strided_slice %502 {offsets = [0, 32], sizes = [2, 32], strides = [1, 1]} : vector<2x128xf32> to vector<2x32xf32>
    %506 = vector.extract_strided_slice %503 {offsets = [0, 64], sizes = [2, 32], strides = [1, 1]} : vector<2x128xf32> to vector<2x32xf32>
    %507 = vector.extract_strided_slice %502 {offsets = [0, 96], sizes = [2, 32], strides = [1, 1]} : vector<2x128xf32> to vector<2x32xf32>
    %508 = arith.mulf %505, %492 : vector<2x32xf32>
    %509 = arith.mulf %504, %506 : vector<2x32xf32>
    %510 = arith.addf %508, %509 : vector<2x32xf32>
    %511 = math.tanh %510 : vector<2x32xf32>
    %512 = arith.mulf %507, %511 : vector<2x32xf32>
    %cst_141 = arith.constant dense<0.000000e+00> : vector<2x128xf32>
    %513 = tpu.matmul %366, %344, %cst_141 {dimension_numbers = #tpu.dot_dimension_numbers<[1], [0], [0], [1], [0, 0, 1, 1], [], []>} : vector<2x32xf32>, vector<32x128xf32>, vector<2x128xf32> -> vector<2x128xf32>
    %514 = arith.addf %360, %513 : vector<2x128xf32>
    %515 = arith.negf %514 : vector<2x128xf32>
    %516 = math.exp %515 : vector<2x128xf32>
    %cst_142 = arith.constant 1.000000e+00 : f32
    %517 = vector.broadcast %cst_142 : f32 to vector<2x128xf32>
    %518 = arith.addf %517, %516 : vector<2x128xf32>
    %519 = arith.divf %517, %518 : vector<2x128xf32>
    %520 = math.tanh %514 : vector<2x128xf32>
    %521 = vector.extract_strided_slice %519 {offsets = [0, 0], sizes = [2, 32], strides = [1, 1]} : vector<2x128xf32> to vector<2x32xf32>
    %522 = vector.extract_strided_slice %519 {offsets = [0, 32], sizes = [2, 32], strides = [1, 1]} : vector<2x128xf32> to vector<2x32xf32>
    %523 = vector.extract_strided_slice %520 {offsets = [0, 64], sizes = [2, 32], strides = [1, 1]} : vector<2x128xf32> to vector<2x32xf32>
    %524 = vector.extract_strided_slice %519 {offsets = [0, 96], sizes = [2, 32], strides = [1, 1]} : vector<2x128xf32> to vector<2x32xf32>
    %525 = arith.mulf %522, %368 : vector<2x32xf32>
    %526 = arith.mulf %521, %523 : vector<2x32xf32>
    %527 = arith.addf %525, %526 : vector<2x32xf32>
    %528 = math.tanh %527 : vector<2x32xf32>
    %529 = arith.mulf %524, %528 : vector<2x32xf32>
    %c0_143 = arith.constant 0 : index
    %c0_144 = arith.constant 0 : index
    %530 = vector.load %arg9[%c0_143, %c0_144] : memref<64x1xf32, #tpu.memory_space<vmem>>, vector<64x1xf32>
    %531 = vector.extract_strided_slice %530 {offsets = [0, 0], sizes = [32, 1], strides = [1, 1]} : vector<64x1xf32> to vector<32x1xf32>
    %cst_145 = arith.constant dense<0.000000e+00> : vector<2x1xf32>
    %532 = tpu.matmul %512, %531, %cst_145 {dimension_numbers = #tpu.dot_dimension_numbers<[1], [0], [0], [1], [0, 0, 1, 1], [], []>} : vector<2x32xf32>, vector<32x1xf32>, vector<2x1xf32> -> vector<2x1xf32>
    %533 = vector.extract_strided_slice %530 {offsets = [32, 0], sizes = [32, 1], strides = [1, 1]} : vector<64x1xf32> to vector<32x1xf32>
    %cst_146 = arith.constant dense<0.000000e+00> : vector<2x1xf32>
    %534 = tpu.matmul %529, %533, %cst_146 {dimension_numbers = #tpu.dot_dimension_numbers<[1], [0], [0], [1], [0, 0, 1, 1], [], []>} : vector<2x32xf32>, vector<32x1xf32>, vector<2x1xf32> -> vector<2x1xf32>
    %535 = arith.addf %532, %534 : vector<2x1xf32>
    %c0_147 = arith.constant 0 : index
    %c0_148 = arith.constant 0 : index
    %536 = vector.load %arg10[%c0_147, %c0_148] : memref<1x1xf32, #tpu.memory_space<vmem>>, vector<1x1xf32>
    %537 = vector.broadcast %536 : vector<1x1xf32> to vector<2x1xf32>
    %538 = arith.addf %535, %537 : vector<2x1xf32>
    %c0_149 = arith.constant 0 : index
    %c0_150 = arith.constant 0 : index
    %539 = vector.load %arg11[%c0_149, %c0_150] : memref<2x1xf32, #tpu.memory_space<vmem>>, vector<2x1xf32>
    tpu.vector_store %arg11[%c0_149, %c0_150], %538 {strides = array<i32>} : memref<2x1xf32, #tpu.memory_space<vmem>>, vector<2x1xf32>,
    return
  }
}

</mosaic_0001>

<bundles_post_ra>
// kernel: bilstm_forward.1
= control target key start
LH: loop header
LB: loop body
LE: loop exit
PB: predicated region body
PF: predicated region fallthrough
CT: control target
= control target key end

     0   :  { %vm70_vm0 = vcmask 1043456   ;;  %vm63_vm1 = vcmask 31744   ;;  %v4493_v3 = vmov 0.0|0.0   ;;  %vm4494_vm2 = vmmov 0   ;;  %s4496_s22 = smov 32   ;;  %s5208_s1 = inlined_call_operand.vmem [shape: f32[2,4,128], index: 1, kind: input, shape index: {}]   ;;  %s5209_s0 = inlined_call_operand.vmem [shape: f32[16,4], index: 0, kind: input, shape index: {}]   ;;  %s5210_s2 = inlined_call_operand.vmem [shape: f32[2,32,128], index: 2, kind: input, shape index: {}]   ;;  %s5211_s8 = inlined_call_operand.vmem [shape: f32[4,2,32], index: 8, kind: input, shape index: {}]   ;;  %s5212_s7 = inlined_call_operand.vmem [shape: f32[4,2,32], index: 7, kind: input, shape index: {}]   ;;  %s5213_s3 = inlined_call_operand.vmem [shape: f32[2,1,128], index: 3, kind: input, shape index: {}]   ;;  %s5214_s4 = inlined_call_operand.vmem [shape: f32[2,64,128], index: 4, kind: input, shape index: {}]   ;;  %s5215_s5 = inlined_call_operand.vmem [shape: f32[2,32,128], index: 5, kind: input, shape index: {}]   ;;  %s5216_s6 = inlined_call_operand.vmem [shape: f32[2,1,128], index: 6, kind: input, shape index: {}]   ;;  %s5217_s9 = inlined_call_operand.vmem [shape: f32[64,1], index: 9, kind: input, shape index: {}]   ;;  %s5218_s10 = inlined_call_operand.<no memory space> [shape: f32[1,1], index: 10, kind: input, shape index: {}]   ;;  %s5219_s11 = inlined_call_operand.vmem [shape: f32[2,1], index: 11, kind: output, shape index: {}]  }
   0x1   :  { %v42_v0 = vld [vmem:[%s5208_s1] sm:$0xf]  ;;  %v3483_v1 = vld [vmem:[%s5208_s1 + $0x4] sm:$0xf]  ;;  %4091 = vmatprep.subr.bf16.mxu0 %v4493_v3  ;;  %v41_v4 = vld [vmem:[%s5209_s0 + $0x8] sm:$0xff]  ;;  %v4495_v11 = vmov 0.0  }
   0x2   :  { %v40_v2 = vld [vmem:[%s5209_s0] sm:$0xff]  ;;  %3740 = vmatprep.subr.msk.mxu1 %vm70_vm0, %v42_v0  ;;  %v49_v6 = vld [vmem:[%s5210_s2 + $0x8] sm:$0xff]  ;;  %v50_v8 = vld [vmem:[%s5210_s2 + $0x10] sm:$0xff]  ;;  %3758 = vmatprep.mubr.msk.f32.mxu0 %vm4494_vm2, %v4495_v11  ;;  %vm239_vm3 = vcmask 261120   ;;  %vm452_vm4 = vcmask 254976   ;;  %vm458_vm5 = vcmask 261126  }
   0x3   :  { %3742 = vmatprep.mubr.msk.f32.mxu1 %vm63_vm1, %v40_v2  ;;  %v48_v5 = vld [vmem:[%s5210_s2] sm:$0xff]  ;;  %3741 = vmatpush3.msk.msra.mxu1 %vm70_vm0, %v42_v0  ;;  %v51_v9 = vld [vmem:[%s5210_s2 + $0x18] sm:$0xff]  ;;  %v3486_v12 = vld [vmem:[%s5210_s2 + $0x28] sm:$0xff]  ;;  %vm673_vm6 = vcmask 257026   ;;  %vm679_vm7 = vcmask 259076   ;;  %vm3477_vm8 = vcmask 1024  }
   0x4   :  { %v4580_v7 = vpack.c.bf16 %v49_v6, %v48_v5  ;;  %v3485_v10 = vld [vmem:[%s5210_s2 + $0x20] sm:$0xff]  ;;  %3743 = vmatmul.mubr.msk.f32.vlgmr.msra.gmra.mrb[0].mxu1 %vm63_vm1, %v41_v4  ;;  %3745 = vmatprep.subr.msk.mxu1 %vm70_vm0, %v3483_v1  ;;  %v4600_v13 = vpack.c.bf16 %v51_v9, %v50_v8  ;;  %v3487_v16 = vld [vmem:[%s5210_s2 + $0x30] sm:$0xff]  ;;  %v3488_v17 = vld [vmem:[%s5210_s2 + $0x38] sm:$0xff] }
   0x5   :  { %3746 = vmatpush3.msk.msra.mxu1 %vm70_vm0, %v3483_v1  ;;  %v4602_v14 = vpack.c.bf16 %v3486_v12, %v3485_v10  ;;  %v3498_v15 = vld [vmem:[%s5211_s8 + $0x2] sm:$0x3]  ;;  %3747 = vmatprep.mubr.msk.f32.mxu1 %vm63_vm1, %v40_v2  ;;  %v233_v19 = vld [vmem:[%s5212_s7] sm:$0x3]  ;;  %v4623_v20 = vpack.c.bf16 %v3488_v17, %v3487_v16 }
   0x6   :  { %4093 = vmatpush3.bf16.msra.mxu0 %v4580_v7  ;;  %v427_v18 = vrot.slane %v3498_v15, 2  ;;  %4097 = vmatprep.subr.bf16.mxu1 %v4493_v3  ;;  %v3497_v21 = vld [vmem:[%s5212_s7 + $0x2] sm:$0x3]  ;;  %v3489_v22 = vld [vmem:[%s5213_s3] ss:$0 sm:$0xff] }
   0x7   :  { %4094 = vmatprep.subr.bf16.mxu0 %v4493_v3  ;;  %v3493_v26 = vld [vmem:[%s5213_s3 + $0x1] ss:$0 sm:$0xff]  ;;  %s4497_s3 = smov 64  }
   0x8   :  { %3748 = vmatmul.mubr.msk.f32.vlgmr.msra.gmra.mrb[2].mxu1 %vm63_vm1, %v41_v4  ;;  %428 = vrot.lane.b32.xlu1 %v427_v18, %s4496_s22  ;;  %v234_v41 = vld [vmem:[%s5211_s8] sm:$0x3] }
   0x9   :  { %4099 = vmatpush3.bf16.msra.mxu1 %v4602_v14  ;;  %3769 = vmatprep.mubr.msk.f32.mxu1 %vm4494_vm2, %v4495_v11 }
   0xa   :  { %4096 = vmatpush3.bf16.msra.mxu0 %v4600_v13  ;;  %4100 = vmatprep.subr.bf16.mxu1 %v4493_v3 }
   0xb   :  { %4103 = vmatprep.subr.bf16.mxu0 %v4493_v3 }
   0xd   :  { %3759 = vmatmul.mubr.msk.f32.vlgmr.msra.gmra.mrb[0].mxu0 %vm239_vm3, %v233_v19  ;;  %4102 = vmatpush3.bf16.msra.mxu1 %v4623_v20 }
   0xe   :  { %4105 = vmatpush3.bf16.msra.mxu0 %v4580_v7  ;;  %4109 = vmatprep.subr.bf16.mxu1 %v4493_v3 }
   0xf   :  { %4106 = vmatprep.subr.bf16.mxu0 %v4493_v3  ;;  %3780 = vmatprep.mubr.msk.f32.mxu0 %vm4494_vm2, %v4495_v11 }
  0x10   :  { %3770 = vmatmul.mubr.msk.f32.vlgmr.msra.gmra.mrb[4].mxu1 %vm239_vm3, %v3497_v21 }
  0x11   :  { %4111 = vmatpush3.bf16.msra.mxu1 %v4602_v14  ;;  %3791 = vmatprep.mubr.msk.f32.mxu1 %vm4494_vm2, %v4495_v11 }
  0x12   :  { %4108 = vmatpush3.bf16.msra.mxu0 %v4600_v13  ;;  %4112 = vmatprep.subr.bf16.mxu1 %v4493_v3 }
  0x13   :  { %4115 = vmatprep.subr.bf16.mxu0 %v4493_v3 }
  0x15   :  { %4114 = vmatpush3.bf16.msra.mxu1 %v4623_v20 }
  0x16   :  { %4121 = vmatprep.subr.bf16.mxu1 %v4493_v3 }
  0x7a   :  { %v429_v54 = vpop.permute.xlu1 %428 }
  0xd7   :  { %v3744_v23 = vpop.f32.mrb[0].mxu1 }
  0xd8   :  { %v4651_v24 = vadd.f32 %v3744_v23, %v3489_v22  ;;  %v140_v25 = vpop.f32.mrb[1].mxu1 }
  0xd9   :  { %v4660_v36 = vadd.f32 %v3489_v22, %v140_v25 }
  0xdb   :  { %v3749_v27 = vpop.f32.mrb[2].mxu1 }
  0xdc   :  { %v224_v28 = vpop.f32.mrb[3].mxu1  ;;  %v4658_v33 = vadd.f32 %v3749_v27, %v3493_v26 }
  0xdd   :  { %v4656_v29 = vadd.f32 %v3493_v26, %v224_v28 }
  0xe0   :  { %v309_v30 = vpop.f32.mrb[0].mxu0 }
  0xe1   :  { %v3760_v31 = vpop.f32.mrb[1].mxu0  ;;  %v313_v38 = vadd.f32 %v309_v30, %v4660_v36 }
  0xe3   :  { %v383_v32 = vpop.f32.mrb[4].mxu1  ;;  %v3501_v43 = vmul.f32 -1.442695, %v313_v38 }
  0xe4   :  { %v388_v34 = vrot.slane %v383_v32, 2  ;;  %v3771_v35 = vpop.f32.mrb[5].mxu1 }
  0xe6   :  { %v390_v37 = vadd.f32 %v388_v34, %v4658_v33 }
  0xe8   :  { %4293 = vtanh.f32 %v390_v37  ;;  %v3502_v42 = vmul.f32 -1.442695, %v390_v37 }
  0xe9   :  { %4295 = vtanh.f32 %v313_v38 }
  0xea   :  { %4297 = vpow2.f32 %v3502_v42 }
  0xeb   :  { %4299 = vpow2.f32 %v3501_v43 }
  0xf2   :  { %v4294_v39 = vpop.eup %4293 }
  0xf3   :  { %433 = vrot.lane.b32.xlu0 %v4294_v39, %s4497_s3  ;;  %v4296_v40 = vpop.eup %4295 }
  0xf4   :  { %v4298_v44 = vpop.eup %4297 }
  0xf5   :  { %v422_v45 = vadd.f32 1.0, %v4298_v44  ;;  %v4300_v46 = vpop.eup %4299 }
  0xf6   :  { %v394_v47 = vadd.f32 1.0, %v4300_v46 }
  0xf7   :  { %404 = vrot.lane.b32.xlu0 %v4296_v40, %s4497_s3  ;;  %4301 = vrcp.f32 %v422_v45 }
  0xf8   :  { %4303 = vrcp.f32 %v394_v47 }
  0xfb   :  { %399 = vrot.lane.b32.xlu0 %v234_v41, %s4496_s22 }
 0x101   :  { %v4302_v48 = vpop.eup %4301 }
 0x102   :  { %v4304_v51 = vpop.eup %4303  ;;  %v431_v55 = vmul.f32 %v4302_v48, %v429_v54 }
 0x165   :  { %v434_v49 = vpop.permute.xlu0 %433 }
 0x166   :  { %v436_v50 = vmul.f32 %v4302_v48, %v434_v49 }
 0x168   :  { %438 = vrot.lane.b32.xlu1 %v436_v50, %s4496_s22 }
 0x169   :  { %v405_v52 = vpop.permute.xlu0 %404 }
 0x16a   :  { %v407_v53 = vmul.f32 %v4304_v51, %v405_v52 }
 0x16c   :  { %409 = vrot.lane.b32.xlu1 %v407_v53, %s4496_s22 }
 0x16d   :  { %v400_v56 = vpop.permute.xlu0 %399 }
 0x16e   :  { %v402_v59 = vmul.f32 %v4304_v51, %v400_v56 }
 0x1da   :  { %v439_v57 = vpop.permute.xlu1 %438 }
 0x1db   :  { %v4672_v58 = vadd.f32 %v439_v57, %v431_v55 }
 0x1dd   :  { %4305 = vtanh.f32 %v4672_v58  ;;  %v650_v39 = vrot.slane %v4672_v58, 2 }
 0x1de   :  { %v410_v60 = vpop.permute.xlu1 %409 }
 0x1df   :  { %v4675_v61 = vadd.f32 %v410_v60, %v402_v59 }
 0x1e1   :  { %4307 = vtanh.f32 %v4675_v61  ;;  %v623_v41 = vrot.slane %v4675_v61, 6 }
 0x1e7   :  { %v4306_v62 = vpop.eup %4305 }
 0x1e8   :  { %444 = vrot.lane.b32.xlu0 %v4306_v62, %s4497_s3 }
 0x1eb   :  { %v4308_v63 = vpop.eup %4307 }
 0x1ec   :  { %415 = vrot.lane.b32.xlu1 %v4308_v63, %s4497_s3 }
 0x25a   :  { %v445_v0 = vpop.permute.xlu0 %444 }
 0x25b   :  { %v4680_v1 = vmul.f32 %v4302_v48, %v445_v0 }
 0x25d   :  { %v536_v2 = vrot.slane %v4680_v1, 6 }
 0x25e   :  { %v416_v4 = vpop.permute.xlu1 %415 }
 0x25f   :  { %v418_v5 = vmul.f32 %v4304_v51, %v416_v4  ;;  %537 = vrot.lane.b32.xlu0 %v536_v2, %s4496_s22 }
 0x261   :  { %449 = vrot.lane.b32.xlu1 %v418_v5, %s4496_s22 }
 0x2d1   :  { %v538_v6 = vpop.permute.xlu0 %537 }
 0x2d2   :  { %3792 = vmatmul.mubr.msk.f32.vlgmr.msra.gmra.mrb[6].mxu1 %vm239_vm3, %v538_v6 }
 0x2d3   :  { %v450_v8 = vpop.permute.xlu1 %449  ;;  %4123 = vmatpush3.bf16.msra.mxu1 %v4602_v14  ;;  %3813 = vmatprep.mubr.msk.f32.mxu1 %vm4494_vm2, %v4495_v11 }
 0x2d4   :  { %453 = vst.msk [vmem:[#allocation2] sm:$0x3] %vm452_vm4, %v450_v8  ;;  %3781 = vmatmul.mubr.msk.f32.vlgmr.msra.gmra.mrb[2].mxu0 %vm239_vm3, %v450_v8  ;;  %4124 = vmatprep.subr.bf16.mxu1 %v4493_v3 }
 0x2d5   :  { %4117 = vmatpush3.bf16.msra.mxu0 %v4580_v7  ;;  %3802 = vmatprep.mubr.msk.f32.mxu0 %vm4494_vm2, %v4495_v11 }
 0x2d6   :  { %4118 = vmatprep.subr.bf16.mxu0 %v4493_v3 }
 0x2d7   :  { %4126 = vmatpush3.bf16.msra.mxu1 %v4623_v20 }
 0x2d8   :  { %4133 = vmatprep.subr.bf16.mxu1 %v4493_v3 }
 0x2d9   :  { %4120 = vmatpush3.bf16.msra.mxu0 %v4600_v13 }
 0x2da   :  { %4127 = vmatprep.subr.bf16.mxu0 %v4493_v3 }
 0x3a5   :  { %v607_v9 = vpop.f32.mrb[6].mxu1 }
 0x3a6   :  { %v612_v10 = vrot.slane %v607_v9, 4  ;;  %v3793_v12 = vpop.f32.mrb[7].mxu1 }
 0x3a7   :  { %v528_v15 = vpop.f32.mrb[2].mxu0 }
 0x3a8   :  { %v614_v16 = vadd.f32 %v612_v10, %v4658_v33  ;;  %v533_v17 = vrot.slane %v528_v15, 6  ;;  %v3782_v18 = vpop.f32.mrb[3].mxu0 }
 0x3aa   :  { %4309 = vtanh.f32 %v614_v16  ;;  %v535_v19 = vadd.f32 %v533_v17, %v4660_v36  ;;  %v3506_v23 = vmul.f32 -1.442695, %v614_v16 }
 0x3ac   :  { %4311 = vtanh.f32 %v535_v19  ;;  %v3505_v25 = vmul.f32 -1.442695, %v535_v19 }
 0x3ad   :  { %4313 = vpow2.f32 %v3506_v23 }
 0x3ae   :  { %4315 = vpow2.f32 %v3505_v25 }
 0x3b4   :  { %v4310_v21 = vpop.eup %4309 }
 0x3b5   :  { %654 = vrot.lane.b32.xlu0 %v4310_v21, %s4497_s3 }
 0x3b6   :  { %v4312_v22 = vpop.eup %4311 }
 0x3b7   :  { %627 = vrot.lane.b32.xlu1 %v4312_v22, %s4497_s3  ;;  %v4314_v26 = vpop.eup %4313 }
 0x3b8   :  { %v4316_v27 = vpop.eup %4315  ;;  %v645_v28 = vadd.f32 1.0, %v4314_v26 }
 0x3b9   :  { %v618_v30 = vadd.f32 1.0, %v4316_v27 }
 0x3ba   :  { %4317 = vrcp.f32 %v645_v28 }
 0x3bb   :  { %4319 = vrcp.f32 %v618_v30 }
 0x3c4   :  { %v4318_v31 = vpop.eup %4317 }
 0x3c5   :  { %v4320_v35 = vpop.eup %4319  ;;  %v652_v40 = vmul.f32 %v4318_v31, %v650_v39 }
 0x3c6   :  { %v625_v44 = vmul.f32 %v4320_v35, %v623_v41 }
 0x427   :  { %v655_v32 = vpop.permute.xlu0 %654 }
 0x428   :  { %v657_v34 = vmul.f32 %v4318_v31, %v655_v32 }
 0x429   :  { %v628_v37 = vpop.permute.xlu1 %627 }
 0x42a   :  { %659 = vrot.lane.b32.xlu0 %v657_v34, %s4496_s22  ;;  %v630_v38 = vmul.f32 %v4320_v35, %v628_v37 }
 0x42c   :  { %632 = vrot.lane.b32.xlu1 %v630_v38, %s4496_s22 }
 0x49c   :  { %v660_v42 = vpop.permute.xlu0 %659 }
 0x49d   :  { %v4708_v43 = vadd.f32 %v660_v42, %v652_v40 }
 0x49e   :  { %v633_v45 = vpop.permute.xlu1 %632 }
 0x49f   :  { %4321 = vtanh.f32 %v4708_v43  ;;  %v4711_v46 = vadd.f32 %v633_v45, %v625_v44  ;;  %v874_v22 = vrot.slane %v4708_v43, 2 }
 0x4a1   :  { %4323 = vtanh.f32 %v4711_v46  ;;  %v847_v25 = vrot.slane %v4711_v46, 6 }
 0x4a9   :  { %v4322_v47 = vpop.eup %4321 }
 0x4aa   :  { %665 = vrot.lane.b32.xlu0 %v4322_v47, %s4497_s3 }
 0x4ab   :  { %v4324_v48 = vpop.eup %4323 }
 0x4ac   :  { %638 = vrot.lane.b32.xlu1 %v4324_v48, %s4497_s3 }
 0x51c   :  { %v666_v49 = vpop.permute.xlu0 %665 }
 0x51d   :  { %v4716_v50 = vmul.f32 %v4318_v31, %v666_v49 }
 0x51e   :  { %v639_v52 = vpop.permute.xlu1 %638 }
 0x51f   :  { %v760_v51 = vrot.slane %v4716_v50, 4  ;;  %v4719_v53 = vmul.f32 %v4320_v35, %v639_v52 }
 0x521   :  { %761 = vrot.lane.b32.xlu0 %v760_v51, %s4496_s22  ;;  %v681_v54 = vrot.slane %v4719_v53, 2 }
 0x523   :  { %682 = vrot.lane.b32.xlu1 %v681_v54, %s4496_s22 }
 0x593   :  { %v762_v55 = vpop.permute.xlu0 %761 }
 0x594   :  { %3814 = vmatmul.mubr.msk.f32.vlgmr.msra.gmra.mrb[8].mxu1 %vm239_vm3, %v762_v55 }
 0x595   :  { %4135 = vmatpush3.bf16.msra.mxu1 %v4602_v14  ;;  %3835 = vmatprep.mubr.msk.f32.mxu1 %vm4494_vm2, %v4495_v11  ;;  %v683_v56 = vpop.permute.xlu1 %682 }
 0x596   :  { %4136 = vmatprep.subr.bf16.mxu1 %v4493_v3  ;;  %3803 = vmatmul.mubr.msk.f32.vlgmr.msra.gmra.mrb[4].mxu0 %vm239_vm3, %v683_v56 }
 0x597   :  { %4129 = vmatpush3.bf16.msra.mxu0 %v4580_v7  ;;  %3824 = vmatprep.mubr.msk.f32.mxu0 %vm4494_vm2, %v4495_v11 }
 0x598   :  { %4130 = vmatprep.subr.bf16.mxu0 %v4493_v3 }
 0x599   :  { %4138 = vmatpush3.bf16.msra.mxu1 %v4623_v20 }
 0x59a   :  { %4145 = vmatprep.subr.bf16.mxu1 %v4493_v3 }
 0x59b   :  { %4132 = vmatpush3.bf16.msra.mxu0 %v4600_v13 }
 0x59c   :  { %4139 = vmatprep.subr.bf16.mxu0 %v4493_v3 }
 0x667   :  { %v831_v57 = vpop.f32.mrb[8].mxu1 }
 0x668   :  { %v836_v58 = vrot.slane %v831_v57, 6  ;;  %v3815_v59 = vpop.f32.mrb[9].mxu1 }
 0x669   :  { %v752_v61 = vpop.f32.mrb[4].mxu0 }
 0x66a   :  { %v838_v60 = vadd.f32 %v836_v58, %v4658_v33  ;;  %v757_v62 = vrot.slane %v752_v61, 4  ;;  %v3804_v63 = vpop.f32.mrb[5].mxu0 }
 0x66c   :  { %4325 = vtanh.f32 %v838_v60  ;;  %v759_v0 = vadd.f32 %v757_v62, %v4660_v36  ;;  %v3510_v5 = vmul.f32 -1.442695, %v838_v60 }
 0x66e   :  { %4327 = vtanh.f32 %v759_v0  ;;  %v3509_v6 = vmul.f32 -1.442695, %v759_v0 }
 0x66f   :  { %4329 = vpow2.f32 %v3510_v5 }
 0x670   :  { %4331 = vpow2.f32 %v3509_v6 }
 0x676   :  { %v4326_v2 = vpop.eup %4325 }
 0x677   :  { %878 = vrot.lane.b32.xlu0 %v4326_v2, %s4497_s3 }
 0x678   :  { %v4328_v4 = vpop.eup %4327 }
 0x679   :  { %851 = vrot.lane.b32.xlu1 %v4328_v4, %s4497_s3  ;;  %v4330_v8 = vpop.eup %4329 }
 0x67a   :  { %v4332_v9 = vpop.eup %4331  ;;  %v869_v10 = vadd.f32 1.0, %v4330_v8 }
 0x67b   :  { %v842_v12 = vadd.f32 1.0, %v4332_v9 }
 0x67c   :  { %4333 = vrcp.f32 %v869_v10 }
 0x67d   :  { %4335 = vrcp.f32 %v842_v12 }
 0x686   :  { %v4334_v15 = vpop.eup %4333 }
 0x687   :  { %v4336_v18 = vpop.eup %4335  ;;  %v876_v23 = vmul.f32 %v4334_v15, %v874_v22 }
 0x688   :  { %v849_v28 = vmul.f32 %v4336_v18, %v847_v25 }
 0x6e9   :  { %v879_v16 = vpop.permute.xlu0 %878 }
 0x6ea   :  { %v881_v17 = vmul.f32 %v4334_v15, %v879_v16 }
 0x6eb   :  { %v852_v19 = vpop.permute.xlu1 %851 }
 0x6ec   :  { %883 = vrot.lane.b32.xlu0 %v881_v17, %s4496_s22  ;;  %v854_v21 = vmul.f32 %v4336_v18, %v852_v19 }
 0x6ee   :  { %856 = vrot.lane.b32.xlu1 %v854_v21, %s4496_s22 }
 0x75e   :  { %v884_v26 = vpop.permute.xlu0 %883 }
 0x75f   :  { %v4746_v27 = vadd.f32 %v884_v26, %v876_v23 }
 0x760   :  { %v857_v30 = vpop.permute.xlu1 %856 }
 0x761   :  { %4337 = vtanh.f32 %v4746_v27  ;;  %v4749_v31 = vadd.f32 %v857_v30, %v849_v28  ;;  %v1093_v2 = vrot.slane %v4746_v27, 2 }
 0x763   :  { %4339 = vtanh.f32 %v4749_v31  ;;  %v1066_v8 = vrot.slane %v4749_v31, 6 }
 0x76b   :  { %v4338_v32 = vpop.eup %4337 }
 0x76c   :  { %889 = vrot.lane.b32.xlu0 %v4338_v32, %s4497_s3 }
 0x76d   :  { %v4340_v34 = vpop.eup %4339 }
 0x76e   :  { %862 = vrot.lane.b32.xlu1 %v4340_v34, %s4497_s3 }
 0x7de   :  { %v890_v35 = vpop.permute.xlu0 %889 }
 0x7df   :  { %v4754_v37 = vmul.f32 %v4334_v15, %v890_v35 }
 0x7e0   :  { %v863_v39 = vpop.permute.xlu1 %862 }
 0x7e1   :  { %v982_v38 = vrot.slane %v4754_v37, 2  ;;  %v4757_v40 = vmul.f32 %v4336_v18, %v863_v39 }
 0x7e3   :  { %983 = vrot.lane.b32.xlu0 %v982_v38, %s4496_s22  ;;  %v903_v41 = vrot.slane %v4757_v40, 4 }
 0x7e5   :  { %904 = vrot.lane.b32.xlu1 %v903_v41, %s4496_s22 }
 0x855   :  { %v984_v42 = vpop.permute.xlu0 %983 }
 0x856   :  { %3836 = vmatmul.mubr.msk.f32.vlgmr.msra.gmra.mrb[10].mxu1 %vm239_vm3, %v984_v42 }
 0x857   :  { %4147 = vmatpush3.bf16.msra.mxu1 %v4602_v14  ;;  %3857 = vmatprep.mubr.msk.f32.mxu1 %vm4494_vm2, %v4495_v11  ;;  %v905_v43 = vpop.permute.xlu1 %904 }
 0x858   :  { %4148 = vmatprep.subr.bf16.mxu1 %v4493_v3  ;;  %3825 = vmatmul.mubr.msk.f32.vlgmr.msra.gmra.mrb[6].mxu0 %vm239_vm3, %v905_v43 }
 0x859   :  { %4141 = vmatpush3.bf16.msra.mxu0 %v4580_v7  ;;  %3846 = vmatprep.mubr.msk.f32.mxu0 %vm4494_vm2, %v4495_v11 }
 0x85a   :  { %4142 = vmatprep.subr.bf16.mxu0 %v4493_v3 }
 0x85b   :  { %4150 = vmatpush3.bf16.msra.mxu1 %v4623_v20 }
 0x85c   :  { %4157 = vmatprep.subr.bf16.mxu1 %v4493_v3 }
 0x85d   :  { %4144 = vmatpush3.bf16.msra.mxu0 %v4600_v13 }
 0x85e   :  { %4151 = vmatprep.subr.bf16.mxu0 %v4493_v3 }
 0x929   :  { %v1053_v44 = vpop.f32.mrb[10].mxu1 }
 0x92a   :  { %v1057_v45 = vadd.f32 %v1053_v44, %v4658_v33  ;;  %v3837_v46 = vpop.f32.mrb[11].mxu1 }
 0x92b   :  { %v974_v47 = vpop.f32.mrb[6].mxu0 }
 0x92c   :  { %4341 = vtanh.f32 %v1057_v45  ;;  %v979_v48 = vrot.slane %v974_v47, 2  ;;  %v3826_v49 = vpop.f32.mrb[7].mxu0  ;;  %v3514_v55 = vmul.f32 -1.442695, %v1057_v45 }
 0x92e   :  { %v981_v51 = vadd.f32 %v979_v48, %v4660_v36 }
 0x930   :  { %4343 = vtanh.f32 %v981_v51  ;;  %v3513_v56 = vmul.f32 -1.442695, %v981_v51 }
 0x931   :  { %4345 = vpow2.f32 %v3514_v55 }
 0x932   :  { %4347 = vpow2.f32 %v3513_v56 }
 0x936   :  { %v4342_v52 = vpop.eup %4341 }
 0x937   :  { %1097 = vrot.lane.b32.xlu0 %v4342_v52, %s4497_s3 }
 0x93a   :  { %v4344_v54 = vpop.eup %4343 }
 0x93b   :  { %1070 = vrot.lane.b32.xlu1 %v4344_v54, %s4497_s3  ;;  %v4346_v57 = vpop.eup %4345 }
 0x93c   :  { %v1088_v33 = vadd.f32 1.0, %v4346_v57  ;;  %v4348_v58 = vpop.eup %4347 }
 0x93d   :  { %v1061_v59 = vadd.f32 1.0, %v4348_v58 }
 0x93e   :  { %4349 = vrcp.f32 %v1088_v33 }
 0x93f   :  { %4351 = vrcp.f32 %v1061_v59 }
 0x948   :  { %v4350_v60 = vpop.eup %4349 }
 0x949   :  { %v4352_v62 = vpop.eup %4351  ;;  %v1095_v4 = vmul.f32 %v4350_v60, %v1093_v2 }
 0x94a   :  { %v1068_v9 = vmul.f32 %v4352_v62, %v1066_v8 }
 0x9a9   :  { %v1098_v61 = vpop.permute.xlu0 %1097 }
 0x9aa   :  { %v1100_v36 = vmul.f32 %v4350_v60, %v1098_v61 }
 0x9ac   :  { %1102 = vrot.lane.b32.xlu0 %v1100_v36, %s4496_s22 }
 0x9ad   :  { %v1071_v63 = vpop.permute.xlu1 %1070 }
 0x9ae   :  { %v1073_v0 = vmul.f32 %v4352_v62, %v1071_v63 }
 0x9b0   :  { %1075 = vrot.lane.b32.xlu1 %v1073_v0, %s4496_s22 }
 0xa1e   :  { %v1103_v5 = vpop.permute.xlu0 %1102 }
 0xa1f   :  { %v4783_v6 = vadd.f32 %v1103_v5, %v1095_v4 }
 0xa21   :  { %4353 = vtanh.f32 %v4783_v6  ;;  %v1309_v54 = vrot.slane %v4783_v6, 2 }
 0xa22   :  { %v1076_v10 = vpop.permute.xlu1 %1075 }
 0xa23   :  { %v4787_v12 = vadd.f32 %v1076_v10, %v1068_v9 }
 0xa25   :  { %4355 = vtanh.f32 %v4787_v12  ;;  %v1282_v33 = vrot.slane %v4787_v12, 6 }
 0xa2b   :  { %v4354_v15 = vpop.eup %4353 }
 0xa2c   :  { %1108 = vrot.lane.b32.xlu0 %v4354_v15, %s4497_s3 }
 0xa2f   :  { %v4356_v16 = vpop.eup %4355 }
 0xa30   :  { %1081 = vrot.lane.b32.xlu1 %v4356_v16, %s4497_s3 }
 0xa9e   :  { %v1109_v17 = vpop.permute.xlu0 %1108 }
 0xa9f   :  { %v1111_v18 = vmul.f32 %v4350_v60, %v1109_v17 }
 0xaa1   :  { %1118 = vrot.lane.b32.xlu0 %v1111_v18, %s4496_s22 }
 0xaa2   :  { %v1082_v19 = vpop.permute.xlu1 %1081 }
 0xaa3   :  { %v4793_v21 = vmul.f32 %v4352_v62, %v1082_v19 }
 0xaa5   :  { %v1122_v22 = vrot.slane %v4793_v21, 6 }
 0xaa7   :  { %1123 = vrot.lane.b32.xlu1 %v1122_v22, %s4496_s22 }
 0xb13   :  { %v1119_v23 = vpop.permute.xlu0 %1118 }
 0xb14   :  { %1121 = vst.msk [vmem:[#allocation3 + $0x8] sm:$0x3] %vm452_vm4, %v1119_v23  ;;  %3858 = vmatmul.mubr.msk.f32.vlgmr.msra.gmra.mrb[12].mxu1 %vm239_vm3, %v1119_v23 }
 0xb15   :  { %4159 = vmatpush3.bf16.msra.mxu1 %v4602_v14  ;;  %3879 = vmatprep.mubr.msk.f32.mxu1 %vm4494_vm2, %v4495_v11 }
 0xb16   :  { %4160 = vmatprep.subr.bf16.mxu1 %v4493_v3 }
 0xb19   :  { %4162 = vmatpush3.bf16.msra.mxu1 %v4623_v20  ;;  %v1124_v25 = vpop.permute.xlu1 %1123 }
 0xb1a   :  { %4169 = vmatprep.subr.bf16.mxu1 %v4493_v3  ;;  %3847 = vmatmul.mubr.msk.f32.vlgmr.msra.gmra.mrb[8].mxu0 %vm239_vm3, %v1124_v25 }
 0xb1b   :  { %4153 = vmatpush3.bf16.msra.mxu0 %v4580_v7  ;;  %3868 = vmatprep.mubr.msk.f32.mxu0 %vm4494_vm2, %v4495_v11 }
 0xb1c   :  { %4154 = vmatprep.subr.bf16.mxu0 %v4493_v3 }
 0xb1f   :  { %4156 = vmatpush3.bf16.msra.mxu0 %v4600_v13 }
 0xb20   :  { %4163 = vmatprep.subr.bf16.mxu0 %v4493_v3 }
 0xbe7   :  { %v1266_v26 = vpop.f32.mrb[12].mxu1 }
 0xbe8   :  { %v1271_v27 = vrot.slane %v1266_v26, 2  ;;  %v3859_v28 = vpop.f32.mrb[13].mxu1 }
 0xbea   :  { %v1273_v30 = vadd.f32 %v1271_v27, %v4656_v29 }
 0xbec   :  { %4357 = vtanh.f32 %v1273_v30  ;;  %v3518_v39 = vmul.f32 -1.442695, %v1273_v30 }
 0xbed   :  { %v1193_v31 = vpop.f32.mrb[8].mxu0 }
 0xbee   :  { %v1197_v32 = vadd.f32 %v1193_v31, %v4651_v24  ;;  %v3848_v34 = vpop.f32.mrb[9].mxu0 }
 0xbf0   :  { %4359 = vtanh.f32 %v1197_v32  ;;  %v3517_v41 = vmul.f32 -1.442695, %v1197_v32 }
 0xbf1   :  { %4361 = vpow2.f32 %v3518_v39 }
 0xbf2   :  { %4363 = vpow2.f32 %v3517_v41 }
 0xbf6   :  { %v4358_v35 = vpop.eup %4357 }
 0xbf7   :  { %1313 = vrot.lane.b32.xlu0 %v4358_v35, %s4497_s3 }
 0xbfa   :  { %v4360_v38 = vpop.eup %4359 }
 0xbfb   :  { %1286 = vrot.lane.b32.xlu1 %v4360_v38, %s4497_s3  ;;  %v4362_v42 = vpop.eup %4361 }
 0xbfc   :  { %v1304_v43 = vadd.f32 1.0, %v4362_v42  ;;  %v4364_v44 = vpop.eup %4363 }
 0xbfd   :  { %v1277_v45 = vadd.f32 1.0, %v4364_v44 }
 0xbfe   :  { %4365 = vrcp.f32 %v1304_v43 }
 0xbff   :  { %4367 = vrcp.f32 %v1277_v45 }
 0xc08   :  { %v4366_v46 = vpop.eup %4365 }
 0xc09   :  { %v4368_v49 = vpop.eup %4367  ;;  %v1311_v55 = vmul.f32 %v4366_v46, %v1309_v54 }
 0xc0a   :  { %v1284_v58 = vmul.f32 %v4368_v49, %v1282_v33 }
 0xc69   :  { %v1314_v47 = vpop.permute.xlu0 %1313 }
 0xc6a   :  { %v1316_v48 = vmul.f32 %v4366_v46, %v1314_v47 }
 0xc6c   :  { %1318 = vrot.lane.b32.xlu0 %v1316_v48, %s4496_s22 }
 0xc6d   :  { %v1287_v51 = vpop.permute.xlu1 %1286 }
 0xc6e   :  { %v1289_v52 = vmul.f32 %v4368_v49, %v1287_v51 }
 0xc70   :  { %1291 = vrot.lane.b32.xlu1 %v1289_v52, %s4496_s22 }
 0xcde   :  { %v1319_v56 = vpop.permute.xlu0 %1318 }
 0xcdf   :  { %v4819_v57 = vadd.f32 %v1319_v56, %v1311_v55 }
 0xce1   :  { %4369 = vtanh.f32 %v4819_v57  ;;  %v1528_v41 = vrot.slane %v4819_v57, 2 }
 0xce2   :  { %v1292_v59 = vpop.permute.xlu1 %1291 }
 0xce3   :  { %v4823_v60 = vadd.f32 %v1292_v59, %v1284_v58 }
 0xce5   :  { %4371 = vtanh.f32 %v4823_v60  ;;  %v1501_v43 = vrot.slane %v4823_v60, 6 }
 0xceb   :  { %v4370_v61 = vpop.eup %4369 }
 0xcec   :  { %1324 = vrot.lane.b32.xlu0 %v4370_v61, %s4497_s3 }
 0xcef   :  { %v4372_v36 = vpop.eup %4371 }
 0xcf0   :  { %1297 = vrot.lane.b32.xlu1 %v4372_v36, %s4497_s3 }
 0xd5e   :  { %v1325_v62 = vpop.permute.xlu0 %1324 }
 0xd5f   :  { %v4828_v63 = vmul.f32 %v4366_v46, %v1325_v62 }
 0xd61   :  { %v1414_v0 = vrot.slane %v4828_v63, 6 }
 0xd62   :  { %v1298_v2 = vpop.permute.xlu1 %1297 }
 0xd63   :  { %1415 = vrot.lane.b32.xlu0 %v1414_v0, %s4496_s22  ;;  %v1300_v4 = vmul.f32 %v4368_v49, %v1298_v2 }
 0xd65   :  { %1329 = vrot.lane.b32.xlu1 %v1300_v4, %s4496_s22 }
 0xdd5   :  { %v1416_v5 = vpop.permute.xlu0 %1415 }
 0xdd6   :  { %3880 = vmatmul.mubr.msk.f32.vlgmr.msra.gmra.mrb[14].mxu1 %vm239_vm3, %v1416_v5 }
 0xdd7   :  { %4171 = vmatpush3.bf16.msra.mxu1 %v4602_v14  ;;  %3901 = vmatprep.mubr.msk.f32.mxu1 %vm4494_vm2, %v4495_v11  ;;  %v1330_v6 = vpop.permute.xlu1 %1329 }
 0xdd8   :  { %4172 = vmatprep.subr.bf16.mxu1 %v4493_v3  ;;  %1332 = vst.msk [vmem:[#allocation2 + $0x8] sm:$0x3] %vm452_vm4, %v1330_v6  ;;  %3869 = vmatmul.mubr.msk.f32.vlgmr.msra.gmra.mrb[10].mxu0 %vm239_vm3, %v1330_v6 }
 0xdd9   :  { %4165 = vmatpush3.bf16.msra.mxu0 %v4580_v7  ;;  %3890 = vmatprep.mubr.msk.f32.mxu0 %vm4494_vm2, %v4495_v11 }
 0xdda   :  { %4166 = vmatprep.subr.bf16.mxu0 %v4493_v3 }
 0xddb   :  { %4174 = vmatpush3.bf16.msra.mxu1 %v4623_v20 }
 0xddc   :  { %4181 = vmatprep.subr.bf16.mxu1 %v4493_v3 }
 0xddd   :  { %4168 = vmatpush3.bf16.msra.mxu0 %v4600_v13 }
 0xdde   :  { %4175 = vmatprep.subr.bf16.mxu0 %v4493_v3 }
 0xea9   :  { %v1485_v8 = vpop.f32.mrb[14].mxu1 }
 0xeaa   :  { %v1490_v9 = vrot.slane %v1485_v8, 4  ;;  %v3881_v10 = vpop.f32.mrb[15].mxu1 }
 0xeab   :  { %v1406_v15 = vpop.f32.mrb[10].mxu0 }
 0xeac   :  { %v1492_v12 = vadd.f32 %v1490_v9, %v4656_v29  ;;  %v1411_v16 = vrot.slane %v1406_v15, 6  ;;  %v3870_v17 = vpop.f32.mrb[11].mxu0 }
 0xeae   :  { %4373 = vtanh.f32 %v1492_v12  ;;  %v1413_v18 = vadd.f32 %v1411_v16, %v4651_v24  ;;  %v3522_v23 = vmul.f32 -1.442695, %v1492_v12 }
 0xeb0   :  { %4375 = vtanh.f32 %v1413_v18  ;;  %v3521_v25 = vmul.f32 -1.442695, %v1413_v18 }
 0xeb1   :  { %4377 = vpow2.f32 %v3522_v23 }
 0xeb2   :  { %4379 = vpow2.f32 %v3521_v25 }
 0xeb8   :  { %v4374_v19 = vpop.eup %4373 }
 0xeb9   :  { %1532 = vrot.lane.b32.xlu0 %v4374_v19, %s4497_s3 }
 0xeba   :  { %v4376_v22 = vpop.eup %4375 }
 0xebb   :  { %1505 = vrot.lane.b32.xlu1 %v4376_v22, %s4497_s3  ;;  %v4378_v26 = vpop.eup %4377 }
 0xebc   :  { %v4380_v27 = vpop.eup %4379  ;;  %v1523_v28 = vadd.f32 1.0, %v4378_v26 }
 0xebd   :  { %v1496_v30 = vadd.f32 1.0, %v4380_v27 }
 0xebe   :  { %4381 = vrcp.f32 %v1523_v28 }
 0xebf   :  { %4383 = vrcp.f32 %v1496_v30 }
 0xec8   :  { %v4382_v31 = vpop.eup %4381 }
 0xec9   :  { %v4384_v35 = vpop.eup %4383  ;;  %v1530_v42 = vmul.f32 %v4382_v31, %v1528_v41 }
 0xeca   :  { %v1503_v46 = vmul.f32 %v4384_v35, %v1501_v43 }
 0xf2b   :  { %v1533_v32 = vpop.permute.xlu0 %1532 }
 0xf2c   :  { %v1535_v34 = vmul.f32 %v4382_v31, %v1533_v32 }
 0xf2d   :  { %v1506_v38 = vpop.permute.xlu1 %1505 }
 0xf2e   :  { %1537 = vrot.lane.b32.xlu0 %v1535_v34, %s4496_s22  ;;  %v1508_v39 = vmul.f32 %v4384_v35, %v1506_v38 }
 0xf30   :  { %1510 = vrot.lane.b32.xlu1 %v1508_v39, %s4496_s22 }
 0xfa0   :  { %v1538_v44 = vpop.permute.xlu0 %1537 }
 0xfa1   :  { %v4856_v45 = vadd.f32 %v1538_v44, %v1530_v42 }
 0xfa2   :  { %v1511_v47 = vpop.permute.xlu1 %1510 }
 0xfa3   :  { %4385 = vtanh.f32 %v4856_v45  ;;  %v4859_v48 = vadd.f32 %v1511_v47, %v1503_v46  ;;  %v1750_v22 = vrot.slane %v4856_v45, 2 }
 0xfa5   :  { %4387 = vtanh.f32 %v4859_v48  ;;  %v1723_v25 = vrot.slane %v4859_v48, 6 }
 0xfad   :  { %v4386_v49 = vpop.eup %4385 }
 0xfae   :  { %1543 = vrot.lane.b32.xlu0 %v4386_v49, %s4497_s3 }
 0xfaf   :  { %v4388_v51 = vpop.eup %4387 }
 0xfb0   :  { %1516 = vrot.lane.b32.xlu1 %v4388_v51, %s4497_s3 }
0x1020   :  { %v1544_v52 = vpop.permute.xlu0 %1543 }
0x1021   :  { %v4864_v54 = vmul.f32 %v4382_v31, %v1544_v52 }
0x1022   :  { %v1517_v56 = vpop.permute.xlu1 %1516 }
0x1023   :  { %v1636_v55 = vrot.slane %v4864_v54, 4  ;;  %v4867_v57 = vmul.f32 %v4384_v35, %v1517_v56 }
0x1025   :  { %1637 = vrot.lane.b32.xlu0 %v1636_v55, %s4496_s22  ;;  %v1557_v33 = vrot.slane %v4867_v57, 2 }
0x1027   :  { %1558 = vrot.lane.b32.xlu1 %v1557_v33, %s4496_s22 }
0x1097   :  { %v1638_v58 = vpop.permute.xlu0 %1637 }
0x1098   :  { %3902 = vmatmul.mubr.msk.f32.vlgmr.msra.gmra.mrb[16].mxu1 %vm239_vm3, %v1638_v58 }
0x1099   :  { %4183 = vmatpush3.bf16.msra.mxu1 %v4602_v14  ;;  %3923 = vmatprep.mubr.msk.f32.mxu1 %vm4494_vm2, %v4495_v11  ;;  %v1559_v59 = vpop.permute.xlu1 %1558 }
0x109a   :  { %4184 = vmatprep.subr.bf16.mxu1 %v4493_v3  ;;  %3891 = vmatmul.mubr.msk.f32.vlgmr.msra.gmra.mrb[12].mxu0 %vm239_vm3, %v1559_v59 }
0x109b   :  { %4177 = vmatpush3.bf16.msra.mxu0 %v4580_v7  ;;  %3912 = vmatprep.mubr.msk.f32.mxu0 %vm4494_vm2, %v4495_v11 }
0x109c   :  { %4178 = vmatprep.subr.bf16.mxu0 %v4493_v3 }
0x109d   :  { %4186 = vmatpush3.bf16.msra.mxu1 %v4623_v20 }
0x109e   :  { %4203 = vmatprep.subr.bf16.mxu1 %v4493_v3 }
0x109f   :  { %4180 = vmatpush3.bf16.msra.mxu0 %v4600_v13 }
0x116b   :  { %v1707_v14 = vpop.f32.mrb[16].mxu1 }
0x116c   :  { %v1712_v60 = vrot.slane %v1707_v14, 6  ;;  %v3903_v61 = vpop.f32.mrb[17].mxu1 }
0x116d   :  { %v1628_v62 = vpop.f32.mrb[12].mxu0 }
0x116e   :  { %v1714_v36 = vadd.f32 %v1712_v60, %v4656_v29  ;;  %v1633_v0 = vrot.slane %v1628_v62, 4  ;;  %v3892_v2 = vpop.f32.mrb[13].mxu0 }
0x1170   :  { %4389 = vtanh.f32 %v1714_v36  ;;  %v1635_v7 = vadd.f32 %v1633_v0, %v4651_v24  ;;  %v3526_v5 = vmul.f32 -1.442695, %v1714_v36 }
0x1172   :  { %4391 = vtanh.f32 %v1635_v7  ;;  %v3525_v13 = vmul.f32 -1.442695, %v1635_v7 }
0x1173   :  { %4393 = vpow2.f32 %v3526_v5 }
0x1174   :  { %4395 = vpow2.f32 %v3525_v13 }
0x117a   :  { %v4390_v4 = vpop.eup %4389 }
0x117b   :  { %1754 = vrot.lane.b32.xlu0 %v4390_v4, %s4497_s3 }
0x117c   :  { %v4392_v20 = vpop.eup %4391 }
0x117d   :  { %1727 = vrot.lane.b32.xlu1 %v4392_v20, %s4497_s3  ;;  %v4394_v6 = vpop.eup %4393 }
0x117e   :  { %v4396_v8 = vpop.eup %4395  ;;  %v1745_v9 = vadd.f32 1.0, %v4394_v6 }
0x117f   :  { %v1718_v10 = vadd.f32 1.0, %v4396_v8 }
0x1180   :  { %4397 = vrcp.f32 %v1745_v9 }
0x1181   :  { %4399 = vrcp.f32 %v1718_v10 }
0x118a   :  { %v4398_v12 = vpop.eup %4397 }
0x118b   :  { %v4400_v17 = vpop.eup %4399  ;;  %v1752_v23 = vmul.f32 %v4398_v12, %v1750_v22 }
0x118c   :  { %v1725_v28 = vmul.f32 %v4400_v17, %v1723_v25  ;;  %v2003_v25 = vld [vmem:[%s5214_s4 + $0x8] sm:$0xff] }
0x11ed   :  { %v1755_v15 = vpop.permute.xlu0 %1754 }
0x11ee   :  { %v1757_v16 = vmul.f32 %v4398_v12, %v1755_v15 }
0x11ef   :  { %v1728_v18 = vpop.permute.xlu1 %1727 }
0x11f0   :  { %1759 = vrot.lane.b32.xlu0 %v1757_v16, %s4496_s22  ;;  %v1730_v19 = vmul.f32 %v4400_v17, %v1728_v18  ;;  %v3535_v16 = vld [vmem:[%s5214_s4 + $0x60] sm:$0xff] }
0x11f2   :  { %1732 = vrot.lane.b32.xlu1 %v1730_v19, %s4496_s22  ;;  %v3537_v19 = vld [vmem:[%s5214_s4 + $0x70] sm:$0xff] }
0x1262   :  { %v1760_v26 = vpop.permute.xlu0 %1759 }
0x1263   :  { %v1762_v27 = vadd.f32 %v1760_v26, %v1752_v23 }
0x1264   :  { %v1733_v30 = vpop.permute.xlu1 %1732 }
0x1265   :  { %4401 = vtanh.f32 %v1762_v27  ;;  %v1735_v31 = vadd.f32 %v1733_v30, %v1725_v28  ;;  %v1969_v4 = vrot.slane %v1762_v27, 2 }
0x1267   :  { %4403 = vtanh.f32 %v1735_v31  ;;  %v1942_v6 = vrot.slane %v1735_v31, 6 }
0x126f   :  { %v4402_v32 = vpop.eup %4401 }
0x1270   :  { %1765 = vrot.lane.b32.xlu0 %v4402_v32, %s4497_s3 }
0x1271   :  { %v4404_v34 = vpop.eup %4403 }
0x1272   :  { %1738 = vrot.lane.b32.xlu1 %v4404_v34, %s4497_s3 }
0x12e2   :  { %v1766_v35 = vpop.permute.xlu0 %1765 }
0x12e3   :  { %v4895_v38 = vmul.f32 %v4398_v12, %v1766_v35 }
0x12e4   :  { %v1739_v41 = vpop.permute.xlu1 %1738 }
0x12e5   :  { %v1858_v39 = vrot.slane %v4895_v38, 2  ;;  %v4898_v42 = vmul.f32 %v4400_v17, %v1739_v41  ;;  %v3536_v17 = vld [vmem:[%s5214_s4 + $0x68] sm:$0xff]  ;;  %v3553_v41 = vld [vmem:[%s5211_s8 + $0x4] sm:$0x3] }
0x12e6   :  { %v4204_v18 = vpack.c.bf16 %v3536_v17, %v3535_v16 }
0x12e7   :  { %1859 = vrot.lane.b32.xlu0 %v1858_v39, %s4496_s22  ;;  %v1779_v43 = vrot.slane %v4898_v42, 4 }
0x12e9   :  { %1780 = vrot.lane.b32.xlu1 %v1779_v43, %s4496_s22 }
0x1359   :  { %v1860_v44 = vpop.permute.xlu0 %1859 }
0x135a   :  { %3924 = vmatmul.mubr.msk.f32.vlgmr.msra.gmra.mrb[18].mxu1 %vm239_vm3, %v1860_v44 }
0x135b   :  { %3956 = vmatprep.mubr.msk.f32.mxu1 %vm4494_vm2, %v4495_v11  ;;  %v1781_v45 = vpop.permute.xlu1 %1780  ;;  %4205 = vmatpush3.bf16.msra.mxu1 %v4204_v18 }
0x135c   :  { %3913 = vmatmul.mubr.msk.f32.vlgmr.msra.gmra.mrb[14].mxu0 %vm239_vm3, %v1781_v45  ;;  %4206 = vmatprep.subr.bf16.mxu1 %v4493_v3 }
0x142d   :  { %v1929_v46 = vpop.f32.mrb[18].mxu1 }
0x142e   :  { %v1933_v47 = vadd.f32 %v1929_v46, %v4656_v29  ;;  %v3925_v48 = vpop.f32.mrb[19].mxu1 }
0x142f   :  { %v1850_v49 = vpop.f32.mrb[14].mxu0  ;;  %v3533_v48 = vld [vmem:[%s5214_s4 + $0x50] sm:$0xff] }
0x1430   :  { %4405 = vtanh.f32 %v1933_v47  ;;  %v1855_v51 = vrot.slane %v1850_v49, 2  ;;  %v3914_v52 = vpop.f32.mrb[15].mxu0  ;;  %v3530_v58 = vmul.f32 -1.442695, %v1933_v47  ;;  %v3534_v49 = vld [vmem:[%s5214_s4 + $0x58] sm:$0xff] }
0x1432   :  { %v1857_v55 = vadd.f32 %v1855_v51, %v4651_v24  ;;  %v4213_v51 = vpack.c.bf16 %v3534_v49, %v3533_v48 }
0x1434   :  { %4407 = vtanh.f32 %v1857_v55  ;;  %v3529_v59 = vmul.f32 -1.442695, %v1857_v55 }
0x1435   :  { %4409 = vpow2.f32 %v3530_v58  ;;  %v2005_v58 = vld [vmem:[%s5214_s4 + $0x18] sm:$0xff] }
0x1436   :  { %4411 = vpow2.f32 %v3529_v59 }
0x143a   :  { %v4406_v56 = vpop.eup %4405 }
0x143b   :  { %1973 = vrot.lane.b32.xlu0 %v4406_v56, %s4497_s3 }
0x143e   :  { %v4408_v33 = vpop.eup %4407 }
0x143f   :  { %1946 = vrot.lane.b32.xlu1 %v4408_v33, %s4497_s3  ;;  %v4410_v14 = vpop.eup %4409  ;;  %v2004_v33 = vld [vmem:[%s5214_s4 + $0x10] sm:$0xff] }
0x1440   :  { %v1964_v29 = vadd.f32 1.0, %v4410_v14  ;;  %v4412_v60 = vpop.eup %4411 }
0x1441   :  { %v1937_v61 = vadd.f32 1.0, %v4412_v60 }
0x1442   :  { %4413 = vrcp.f32 %v1964_v29  ;;  %v4199_v29 = vpack.c.bf16 %v2005_v58, %v2004_v33 }
0x1443   :  { %4415 = vrcp.f32 %v1937_v61  ;;  %v2022_v61 = vld [vmem:[%s5215_s5] sm:$0xff] }
0x144c   :  { %v4414_v36 = vpop.eup %4413 }
0x144d   :  { %v4416_v0 = vpop.eup %4415  ;;  %v1971_v20 = vmul.f32 %v4414_v36, %v1969_v4 }
0x144e   :  { %v1944_v8 = vmul.f32 %v4416_v0, %v1942_v6 }
0x14ad   :  { %v1974_v62 = vpop.permute.xlu0 %1973 }
0x14ae   :  { %v1976_v24 = vmul.f32 %v4414_v36, %v1974_v62 }
0x14b0   :  { %1978 = vrot.lane.b32.xlu0 %v1976_v24, %s4496_s22 }
0x14b1   :  { %v1947_v2 = vpop.permute.xlu1 %1946 }
0x14b2   :  { %v1949_v7 = vmul.f32 %v4416_v0, %v1947_v2  ;;  %v2025_v2 = vld [vmem:[%s5215_s5 + $0x18] sm:$0xff] }
0x14b4   :  { %1951 = vrot.lane.b32.xlu1 %v1949_v7, %s4496_s22 }
0x1522   :  { %v1979_v5 = vpop.permute.xlu0 %1978 }
0x1523   :  { %v1981_v13 = vadd.f32 %v1979_v5, %v1971_v20  ;;  %v3552_v5 = vld [vmem:[%s5212_s7 + $0x4] sm:$0x3] }
0x1525   :  { %4417 = vtanh.f32 %v1981_v13  ;;  %v3548_v13 = vld [vmem:[%s5216_s6] ss:$0 sm:$0xff] }
0x1526   :  { %v1952_v9 = vpop.permute.xlu1 %1951 }
0x1527   :  { %v1954_v10 = vadd.f32 %v1952_v9, %v1944_v8 }
0x1529   :  { %4419 = vtanh.f32 %v1954_v10 }
0x152f   :  { %v4418_v12 = vpop.eup %4417 }
0x1530   :  { %1984 = vrot.lane.b32.xlu0 %v4418_v12, %s4497_s3 }
0x1533   :  { %v4420_v15 = vpop.eup %4419 }
0x1534   :  { %1334 = vrot.lane.b32.xlu0 %v4828_v63, %s4496_s22  ;;  %1957 = vrot.lane.b32.xlu1 %v4420_v15, %s4497_s3  ;;  %v3538_v63 = vld [vmem:[%s5214_s4 + $0x78] sm:$0xff] }
0x1535   :  { %v4207_v22 = vpack.c.bf16 %v3538_v63, %v3537_v19 }
0x1537   :  { %4208 = vmatpush3.bf16.msra.mxu1 %v4207_v22 }
0x1538   :  { %1775 = vrot.lane.b32.xlu0 %v4895_v38, %s4496_s22  ;;  %1553 = vrot.lane.b32.xlu1 %v4864_v54, %s4496_s22  ;;  %v2006_v54 = vld [vmem:[%s5214_s4 + $0x20] sm:$0xff] }
0x1539   :  { %4209 = vmatprep.subr.bf16.mxu1 %v4493_v3 }
0x153c   :  { %455 = vrot.lane.b32.xlu0 %v4680_v1, %s4496_s22  ;;  %676 = vrot.lane.b32.xlu1 %v4716_v50, %s4496_s22  ;;  %v2007_v1 = vld [vmem:[%s5214_s4 + $0x28] sm:$0xff]  ;;  %v2008_v50 = vld [vmem:[%s5214_s4 + $0x30] sm:$0xff] }
0x153d   :  { %v4187_v23 = vpack.c.bf16 %v2007_v1, %v2006_v54 }
0x153f   :  { %4188 = vmatprep.subr.bf16.mxu0 %v4187_v23 }
0x1540   :  { %899 = vrot.lane.b32.xlu0 %v4754_v37, %s4496_s22  ;;  %4190 = vmatpush3.bf16.msra.mxu0 %v4187_v23  ;;  %v2009_v37 = vld [vmem:[%s5214_s4 + $0x38] sm:$0xff] }
0x1544   :  { %894 = vrot.lane.b32.xlu0 %v4757_v40, %s4496_s22  ;;  %v4191_v40 = vpack.c.bf16 %v2009_v37, %v2008_v50 }
0x1546   :  { %4192 = vmatprep.subr.bf16.mxu0 %v4191_v40 }
0x1547   :  { %4194 = vmatpush3.bf16.msra.mxu0 %v4191_v40 }
0x1548   :  { %1548 = vrot.lane.b32.xlu0 %v4867_v57, %s4496_s22  ;;  %v2002_v57 = vld [vmem:[%s5214_s4] sm:$0xff] }
0x1549   :  { %v4195_v27 = vpack.c.bf16 %v2003_v25, %v2002_v57 }
0x154b   :  { %4196 = vmatprep.subr.bf16.mxu0 %v4195_v27 }
0x15a2   :  { %v1985_v26 = vpop.permute.xlu0 %1984 }
0x15a3   :  { %v1987_v28 = vmul.f32 %v4414_v36, %v1985_v26  ;;  %v2023_v36 = vld [vmem:[%s5215_s5 + $0x8] sm:$0xff] }
0x15a4   :  { %v5021_v24 = vpack.c.bf16 %v2023_v36, %v2022_v61 }
0x15a5   :  { %1994 = vrot.lane.b32.xlu1 %v1987_v28, %s4496_s22 }
0x15a6   :  { %v1335_v30 = vpop.permute.xlu0 %1334  ;;  %v1958_v31 = vpop.permute.xlu1 %1957 }
0x15a7   :  { %1337 = vst.msk [vmem:[#allocation3] sm:$0xc0] %vm458_vm5, %v1335_v30  ;;  %v1960_v32 = vmul.f32 %v4416_v0, %v1958_v31  ;;  %v2024_v0 = vld [vmem:[%s5215_s5 + $0x10] sm:$0xff] }
0x15a8   :  { %v5031_v20 = vpack.c.bf16 %v2025_v2, %v2024_v0 }
0x15a9   :  { %670 = vrot.lane.b32.xlu1 %v4719_v53, %s4496_s22  ;;  %1989 = vrot.lane.b32.xlu0 %v1960_v32, %s4496_s22 }
0x15aa   :  { %v1776_v34 = vpop.permute.xlu0 %1775  ;;  %v1554_v35 = vpop.permute.xlu1 %1553 }
0x15ab   :  { %1778 = vst.msk [vmem:[#allocation3] sm:$0xc] %vm673_vm6, %v1776_v34 }
0x15ac   :  { %1556 = vst.msk [vmem:[#allocation3] sm:$0x30] %vm679_vm7, %v1554_v35 }
0x15ad   :  { %1113 = vrot.lane.b32.xlu1 %v4793_v21, %s4496_s22  ;;  %2444 = vrot.lane.b32.xlu0 %v3553_v41, %s4496_s22  ;;  %v3531_v21 = vld [vmem:[%s5214_s4 + $0x40] sm:$0xff] }
0x15ae   :  { %v456_v38 = vpop.permute.xlu0 %455  ;;  %v677_v39 = vpop.permute.xlu1 %676 }
0x15af   :  { %459 = vst.msk [vmem:[#allocation3 + $0x8] sm:$0xc0] %vm458_vm5, %v456_v38 }
0x15b0   :  { %680 = vst.msk [vmem:[#allocation3 + $0x8] sm:$0x30] %vm679_vm7, %v677_v39 }
0x15b1   :  { %1770 = vrot.lane.b32.xlu1 %v4898_v42, %s4496_s22  ;;  %v3532_v42 = vld [vmem:[%s5214_s4 + $0x48] sm:$0xff] }
0x15b2   :  { %v900_v53 = vpop.permute.xlu0 %899  ;;  %v4210_v46 = vpack.c.bf16 %v3532_v42, %v3531_v21 }
0x15b3   :  { %902 = vst.msk [vmem:[#allocation3 + $0x8] sm:$0xc] %vm673_vm6, %v900_v53 }
0x15b6   :  { %v895_v43 = vpop.permute.xlu0 %894 }
0x15b7   :  { %897 = vst.msk [vmem:[#allocation2] sm:$0x30] %vm679_vm7, %v895_v43 }
0x15ba   :  { %v1549_v44 = vpop.permute.xlu0 %1548  ;;  %v2001_v45 = vld [vmem:[#allocation3 + $0x8] sm:$0xff] }
0x15bb   :  { %1551 = vst.msk [vmem:[#allocation2 + $0x8] sm:$0xc] %vm673_vm6, %v1549_v44  ;;  %v2201_v47 = vrot.slane %v2001_v45, 6 }
0x15bd   :  { %3957 = vmatmul.mubr.msk.f32.vlgmr.msra.gmra.mrb[20].mxu1 %vm239_vm3, %v2201_v47 }
0x15be   :  { %4211 = vmatpush3.bf16.msra.mxu1 %v4210_v46  ;;  %3967 = vmatprep.mubr.msk.f32.mxu1 %vm4494_vm2, %v4495_v11 }
0x15bf   :  { %4212 = vmatprep.subr.bf16.mxu1 %v4493_v3 }
0x15c2   :  { %4214 = vmatpush3.bf16.msra.mxu1 %v4213_v51 }
0x15c3   :  { %4221 = vmatprep.subr.bf16.mxu1 %v4493_v3 }
0x1617   :  { %v1995_v52 = vpop.permute.xlu1 %1994 }
0x1618   :  { %1997 = vst.msk [vmem:[#allocation3] sm:$0x3] %vm452_vm4, %v1995_v52 }
0x161b   :  { %v671_v55 = vpop.permute.xlu1 %670  ;;  %v1990_v56 = vpop.permute.xlu0 %1989 }
0x161c   :  { %674 = vst.msk [vmem:[#allocation2] sm:$0xc] %vm673_vm6, %v671_v55 }
0x161d   :  { %1992 = vst.msk [vmem:[#allocation2 + $0x8] sm:$0xc0] %vm458_vm5, %v1990_v56 }
0x161f   :  { %v1114_v59 = vpop.permute.xlu1 %1113  ;;  %v2000_v14 = vld [vmem:[#allocation3] sm:$0xff]  ;;  %v2445_v23 = vpop.permute.xlu0 %2444 }
0x1620   :  { %1116 = vst.msk [vmem:[#allocation2] sm:$0xc0] %vm458_vm5, %v1114_v59  ;;  %3934 = vmatprep.mubr.msk.f32.mxu0 %vm239_vm3, %v2000_v14 }
0x1621   :  { %3935 = vmatmul.mubr.msk.f32.vlgmr.msra.gmra.mrb[16].mxu0 %vm239_vm3, %v2001_v45 }
0x1622   :  { %4198 = vmatpush3.bf16.msra.mxu0 %v4195_v27 }
0x1623   :  { %v1771_v60 = vpop.permute.xlu1 %1770  ;;  %4200 = vmatprep.subr.bf16.mxu0 %v4199_v29 }
0x1624   :  { %1773 = vst.msk [vmem:[#allocation2 + $0x8] sm:$0x30] %vm679_vm7, %v1771_v60 }
0x1626   :  { %4202 = vmatpush3.bf16.msra.mxu0 %v4199_v29 }
0x1627   :  { %v1998_v62 = vld [vmem:[#allocation2] sm:$0xff]  ;;  %4215 = vmatprep.subr.bf16.mxu0 %v4493_v3 }
0x1628   :  { %3945 = vmatprep.mubr.msk.f32.mxu0 %vm239_vm3, %v1998_v62 }
0x162b   :  { %v1999_v7 = vld [vmem:[#allocation2 + $0x8] sm:$0xff] }
0x162c   :  { %3946 = vmatmul.mubr.msk.f32.vlgmr.msra.gmra.mrb[16].mxu0 %vm239_vm3, %v1999_v7  ;;  %v2274_v4 = vrot.slane %v1999_v7, 6 }
0x162d   :  { %4217 = vmatpush3.bf16.msra.mxu0 %v5021_v24  ;;  %3978 = vmatprep.mubr.msk.f32.mxu0 %vm4494_vm2, %v4495_v11 }
0x162e   :  { %3968 = vmatmul.mubr.msk.f32.vlgmr.msra.gmra.mrb[20].mxu1 %vm239_vm3, %v2274_v4  ;;  %4218 = vmatprep.subr.bf16.mxu0 %v4493_v3 }
0x162f   :  { %4223 = vmatpush3.bf16.msra.mxu1 %v5021_v24  ;;  %3989 = vmatprep.mubr.msk.f32.mxu1 %vm4494_vm2, %v4495_v11 }
0x1630   :  { %4224 = vmatprep.subr.bf16.mxu1 %v4493_v3 }
0x1631   :  { %4220 = vmatpush3.bf16.msra.mxu0 %v5031_v20 }
0x1632   :  { %4227 = vmatprep.subr.bf16.mxu0 %v4493_v3 }
0x1633   :  { %4226 = vmatpush3.bf16.msra.mxu1 %v5031_v20 }
0x1634   :  { %3979 = vmatmul.mubr.msk.f32.vlgmr.msra.gmra.mrb[18].mxu0 %vm239_vm3, %v3552_v5  ;;  %4233 = vmatprep.subr.bf16.mxu1 %v4493_v3 }
0x1635   :  { %4229 = vmatpush3.bf16.msra.mxu0 %v5021_v24  ;;  %4000 = vmatprep.mubr.msk.f32.mxu0 %vm4494_vm2, %v4495_v11 }
0x1636   :  { %4230 = vmatprep.subr.bf16.mxu0 %v4493_v3 }
0x1639   :  { %4232 = vmatpush3.bf16.msra.mxu0 %v5031_v20 }
0x163a   :  { %4239 = vmatprep.subr.bf16.mxu0 %v4493_v3 }
0x16ff   :  { %v3947_v6 = vpop.f32.mrb[16].mxu0 }
0x1700   :  { %v5058_v8 = vadd.f32 %v3947_v6, %v3548_v13  ;;  %v2184_v9 = vpop.f32.mrb[17].mxu0 }
0x1701   :  { %v5060_v10 = vadd.f32 %v3548_v13, %v2184_v9 }
0x1707   :  { %v2431_v12 = vpop.f32.mrb[18].mxu0 }
0x1708   :  { %v2435_v15 = vadd.f32 %v2431_v12, %v5060_v10  ;;  %v3980_v16 = vpop.f32.mrb[19].mxu0 }
0x170a   :  { %4421 = vtanh.f32 %v2435_v15  ;;  %v3557_v18 = vmul.f32 -1.442695, %v2435_v15 }
0x170c   :  { %4423 = vpow2.f32 %v3557_v18 }
0x1714   :  { %v4422_v17 = vpop.eup %4421 }
0x1715   :  { %2449 = vrot.lane.b32.xlu1 %v4422_v17, %s4497_s3 }
0x1716   :  { %v4424_v19 = vpop.eup %4423 }
0x1717   :  { %v2439_v63 = vadd.f32 1.0, %v4424_v19 }
0x1719   :  { %4425 = vrcp.f32 %v2439_v63 }
0x1723   :  { %v4426_v22 = vpop.eup %4425 }
0x1724   :  { %v2447_v50 = vmul.f32 %v4426_v22, %v2445_v23 }
0x1787   :  { %v2450_v54 = vpop.permute.xlu1 %2449 }
0x1788   :  { %v2452_v1 = vmul.f32 %v4426_v22, %v2450_v54 }
0x178a   :  { %2454 = vrot.lane.b32.xlu1 %v2452_v1, %s4496_s22 }
0x17fc   :  { %v2455_v37 = vpop.permute.xlu1 %2454 }
0x17fd   :  { %v2457_v40 = vadd.f32 %v2455_v37, %v2447_v50 }
0x17ff   :  { %4427 = vtanh.f32 %v2457_v40  ;;  %v2551_v21 = vrot.slane %v2457_v40, 6 }
0x1809   :  { %v4428_v57 = vpop.eup %4427 }
0x180a   :  { %2460 = vrot.lane.b32.xlu0 %v4428_v57, %s4497_s3 }
0x187c   :  { %v2461_v25 = vpop.permute.xlu0 %2460 }
0x187d   :  { %v2463_v26 = vmul.f32 %v4426_v22, %v2461_v25 }
0x187f   :  { %2465 = vrot.lane.b32.xlu1 %v2463_v26, %s4496_s22 }
0x18f1   :  { %v2466_v27 = vpop.permute.xlu1 %2465 }
0x18f2   :  { %3990 = vmatmul.mubr.msk.f32.vlgmr.msra.gmra.mrb[22].mxu1 %vm239_vm3, %v2466_v27 }
0x18f3   :  { %4235 = vmatpush3.bf16.msra.mxu1 %v5021_v24  ;;  %4011 = vmatprep.mubr.msk.f32.mxu1 %vm4494_vm2, %v4495_v11 }
0x18f4   :  { %4236 = vmatprep.subr.bf16.mxu1 %v4493_v3 }
0x18f7   :  { %4238 = vmatpush3.bf16.msra.mxu1 %v5031_v20 }
0x18f8   :  { %4245 = vmatprep.subr.bf16.mxu1 %v4493_v3 }
0x19c5   :  { %v2535_v28 = vpop.f32.mrb[22].mxu1 }
0x19c6   :  { %v2540_v30 = vrot.slane %v2535_v28, 6  ;;  %v3991_v31 = vpop.f32.mrb[23].mxu1 }
0x19c8   :  { %v2542_v32 = vadd.f32 %v2540_v30, %v5060_v10 }
0x19ca   :  { %4429 = vtanh.f32 %v2542_v32  ;;  %v3559_v35 = vmul.f32 -1.442695, %v2542_v32 }
0x19cc   :  { %4431 = vpow2.f32 %v3559_v35 }
0x19d4   :  { %v4430_v34 = vpop.eup %4429 }
0x19d5   :  { %2555 = vrot.lane.b32.xlu0 %v4430_v34, %s4497_s3 }
0x19d6   :  { %v4432_v38 = vpop.eup %4431 }
0x19d7   :  { %v2546_v39 = vadd.f32 1.0, %v4432_v38 }
0x19d9   :  { %4433 = vrcp.f32 %v2546_v39 }
0x19e3   :  { %v4434_v53 = vpop.eup %4433 }
0x19e4   :  { %v2553_v42 = vmul.f32 %v4434_v53, %v2551_v21 }
0x1a47   :  { %v2556_v41 = vpop.permute.xlu0 %2555 }
0x1a48   :  { %v2558_v43 = vmul.f32 %v4434_v53, %v2556_v41 }
0x1a4a   :  { %2560 = vrot.lane.b32.xlu1 %v2558_v43, %s4496_s22 }
0x1abc   :  { %v2561_v44 = vpop.permute.xlu1 %2560 }
0x1abd   :  { %v2563_v45 = vadd.f32 %v2561_v44, %v2553_v42 }
0x1abf   :  { %4435 = vtanh.f32 %v2563_v45  ;;  %v2658_v62 = vrot.slane %v2563_v45, 6 }
0x1ac9   :  { %v4436_v46 = vpop.eup %4435 }
0x1aca   :  { %2566 = vrot.lane.b32.xlu0 %v4436_v46, %s4497_s3 }
0x1b3c   :  { %v2567_v47 = vpop.permute.xlu0 %2566 }
0x1b3d   :  { %v2569_v48 = vmul.f32 %v4434_v53, %v2567_v47 }
0x1b3f   :  { %v2571_v49 = vrot.slane %v2569_v48, 2 }
0x1b41   :  { %2572 = vrot.lane.b32.xlu1 %v2571_v49, %s4496_s22 }
0x1bb3   :  { %v2573_v51 = vpop.permute.xlu1 %2572 }
0x1bb4   :  { %4001 = vmatmul.mubr.msk.f32.vlgmr.msra.gmra.mrb[20].mxu0 %vm239_vm3, %v2573_v51 }
0x1bb5   :  { %4241 = vmatpush3.bf16.msra.mxu0 %v5021_v24  ;;  %4022 = vmatprep.mubr.msk.f32.mxu0 %vm4494_vm2, %v4495_v11 }
0x1bb6   :  { %4242 = vmatprep.subr.bf16.mxu0 %v4493_v3 }
0x1bb9   :  { %4244 = vmatpush3.bf16.msra.mxu0 %v5031_v20 }
0x1bba   :  { %4251 = vmatprep.subr.bf16.mxu0 %v4493_v3 }
0x1c87   :  { %v2642_v52 = vpop.f32.mrb[20].mxu0 }
0x1c88   :  { %v2647_v55 = vrot.slane %v2642_v52, 4  ;;  %v4002_v56 = vpop.f32.mrb[21].mxu0 }
0x1c8a   :  { %v2649_v33 = vadd.f32 %v2647_v55, %v5060_v10 }
0x1c8c   :  { %4437 = vtanh.f32 %v2649_v33  ;;  %v3561_v59 = vmul.f32 -1.442695, %v2649_v33 }
0x1c8e   :  { %4439 = vpow2.f32 %v3561_v59 }
0x1c96   :  { %v4438_v58 = vpop.eup %4437 }
0x1c97   :  { %2662 = vrot.lane.b32.xlu0 %v4438_v58, %s4497_s3 }
0x1c98   :  { %v4440_v14 = vpop.eup %4439 }
0x1c99   :  { %v2653_v29 = vadd.f32 1.0, %v4440_v14 }
0x1c9b   :  { %4441 = vrcp.f32 %v2653_v29 }
0x1ca5   :  { %v4442_v60 = vpop.eup %4441 }
0x1ca6   :  { %v2660_v0 = vmul.f32 %v4442_v60, %v2658_v62 }
0x1d09   :  { %v2663_v61 = vpop.permute.xlu0 %2662 }
0x1d0a   :  { %v2665_v36 = vmul.f32 %v4442_v60, %v2663_v61 }
0x1d0c   :  { %2667 = vrot.lane.b32.xlu1 %v2665_v36, %s4496_s22 }
0x1d7e   :  { %v2668_v2 = vpop.permute.xlu1 %2667 }
0x1d7f   :  { %v2670_v7 = vadd.f32 %v2668_v2, %v2660_v0 }
0x1d81   :  { %4443 = vtanh.f32 %v2670_v7  ;;  %v2765_v50 = vrot.slane %v2670_v7, 6 }
0x1d8b   :  { %v4444_v4 = vpop.eup %4443 }
0x1d8c   :  { %2673 = vrot.lane.b32.xlu0 %v4444_v4, %s4497_s3 }
0x1dfe   :  { %v2674_v5 = vpop.permute.xlu0 %2673 }
0x1dff   :  { %v2676_v13 = vmul.f32 %v4442_v60, %v2674_v5 }
0x1e01   :  { %v2678_v6 = vrot.slane %v2676_v13, 4 }
0x1e03   :  { %2679 = vrot.lane.b32.xlu1 %v2678_v6, %s4496_s22 }
0x1e75   :  { %v2680_v9 = vpop.permute.xlu1 %2679 }
0x1e76   :  { %4012 = vmatmul.mubr.msk.f32.vlgmr.msra.gmra.mrb[24].mxu1 %vm239_vm3, %v2680_v9 }
0x1e77   :  { %4247 = vmatpush3.bf16.msra.mxu1 %v5021_v24  ;;  %4033 = vmatprep.mubr.msk.f32.mxu1 %vm4494_vm2, %v4495_v11 }
0x1e78   :  { %4248 = vmatprep.subr.bf16.mxu1 %v4493_v3 }
0x1e7b   :  { %4250 = vmatpush3.bf16.msra.mxu1 %v5031_v20 }
0x1e7c   :  { %4257 = vmatprep.subr.bf16.mxu1 %v4493_v3 }
0x1f49   :  { %v2749_v12 = vpop.f32.mrb[24].mxu1 }
0x1f4a   :  { %v2754_v15 = vrot.slane %v2749_v12, 2  ;;  %v4013_v16 = vpop.f32.mrb[25].mxu1 }
0x1f4c   :  { %v2756_v17 = vadd.f32 %v2754_v15, %v5060_v10 }
0x1f4e   :  { %4445 = vtanh.f32 %v2756_v17  ;;  %v3563_v19 = vmul.f32 -1.442695, %v2756_v17 }
0x1f50   :  { %4447 = vpow2.f32 %v3563_v19 }
0x1f58   :  { %v4446_v18 = vpop.eup %4445 }
0x1f59   :  { %2769 = vrot.lane.b32.xlu0 %v4446_v18, %s4497_s3 }
0x1f5a   :  { %v4448_v63 = vpop.eup %4447 }
0x1f5b   :  { %v2760_v22 = vadd.f32 1.0, %v4448_v63 }
0x1f5d   :  { %4449 = vrcp.f32 %v2760_v22 }
0x1f67   :  { %v4450_v54 = vpop.eup %4449 }
0x1f68   :  { %v2767_v37 = vmul.f32 %v4450_v54, %v2765_v50 }
0x1fcb   :  { %v2770_v1 = vpop.permute.xlu0 %2769 }
0x1fcc   :  { %v2772_v23 = vmul.f32 %v4450_v54, %v2770_v1 }
0x1fce   :  { %2774 = vrot.lane.b32.xlu1 %v2772_v23, %s4496_s22 }
0x2040   :  { %v2775_v40 = vpop.permute.xlu1 %2774 }
0x2041   :  { %v2777_v57 = vadd.f32 %v2775_v40, %v2767_v37 }
0x2043   :  { %4451 = vtanh.f32 %v2777_v57  ;;  %v2869_v21 = vrot.slane %v2777_v57, 6 }
0x204d   :  { %v4452_v10 = vpop.eup %4451 }
0x204e   :  { %2780 = vrot.lane.b32.xlu0 %v4452_v10, %s4497_s3 }
0x20c0   :  { %v2781_v25 = vpop.permute.xlu0 %2780 }
0x20c1   :  { %v2783_v26 = vmul.f32 %v4450_v54, %v2781_v25  ;;  %v3540_v25 = vld [vmem:[%s5215_s5 + $0x20] sm:$0xff] }
0x20c3   :  { %v2785_v27 = vrot.slane %v2783_v26, 6  ;;  %v3541_v26 = vld [vmem:[%s5215_s5 + $0x28] sm:$0xff] }
0x20c5   :  { %2786 = vrot.lane.b32.xlu1 %v2785_v27, %s4496_s22  ;;  %v4264_v27 = vpack.c.bf16 %v3541_v26, %v3540_v25 }
0x2137   :  { %v2787_v28 = vpop.permute.xlu1 %2786 }
0x2138   :  { %4023 = vmatmul.mubr.msk.f32.vlgmr.msra.gmra.mrb[22].mxu0 %vm239_vm3, %v2787_v28  ;;  %v3542_v28 = vld [vmem:[%s5215_s5 + $0x30] sm:$0xff] }
0x2139   :  { %4253 = vmatpush3.bf16.msra.mxu0 %v5021_v24  ;;  %4044 = vmatprep.mubr.msk.f32.mxu0 %vm4494_vm2, %v4495_v11 }
0x213a   :  { %4254 = vmatprep.subr.bf16.mxu0 %v4493_v3 }
0x213d   :  { %4256 = vmatpush3.bf16.msra.mxu0 %v5031_v20 }
0x213e   :  { %4269 = vmatprep.subr.bf16.mxu0 %v4493_v3 }
0x220b   :  { %v2856_v30 = vpop.f32.mrb[22].mxu0 }
0x220c   :  { %v2860_v31 = vadd.f32 %v2856_v30, %v5058_v8  ;;  %v4024_v32 = vpop.f32.mrb[23].mxu0  ;;  %v3543_v30 = vld [vmem:[%s5215_s5 + $0x38] sm:$0xff] }
0x220d   :  { %v4267_v32 = vpack.c.bf16 %v3543_v30, %v3542_v28 }
0x220e   :  { %4453 = vtanh.f32 %v2860_v31  ;;  %v3565_v35 = vmul.f32 -1.442695, %v2860_v31 }
0x2210   :  { %4455 = vpow2.f32 %v3565_v35 }
0x2218   :  { %v4454_v34 = vpop.eup %4453 }
0x2219   :  { %2873 = vrot.lane.b32.xlu0 %v4454_v34, %s4497_s3  ;;  %v3554_v34 = vld [vmem:[%s5212_s7 + $0x6] sm:$0x3] }
0x221a   :  { %v4456_v38 = vpop.eup %4455 }
0x221b   :  { %v2864_v39 = vadd.f32 1.0, %v4456_v38 }
0x221d   :  { %4457 = vrcp.f32 %v2864_v39 }
0x2227   :  { %v4458_v53 = vpop.eup %4457 }
0x2228   :  { %v2871_v42 = vmul.f32 %v4458_v53, %v2869_v21 }
0x228b   :  { %v2874_v41 = vpop.permute.xlu0 %2873 }
0x228c   :  { %v2876_v43 = vmul.f32 %v4458_v53, %v2874_v41  ;;  %v3551_v41 = vld [vmem:[%s5216_s6 + $0x1] ss:$0 sm:$0xff] }
0x228e   :  { %2878 = vrot.lane.b32.xlu1 %v2876_v43, %s4496_s22 }
0x2300   :  { %v2879_v44 = vpop.permute.xlu1 %2878 }
0x2301   :  { %v2881_v45 = vadd.f32 %v2879_v44, %v2871_v42 }
0x2303   :  { %4459 = vtanh.f32 %v2881_v45 }
0x230d   :  { %v4460_v46 = vpop.eup %4459 }
0x230e   :  { %2884 = vrot.lane.b32.xlu0 %v4460_v46, %s4497_s3  ;;  %v3555_v46 = vld [vmem:[%s5211_s8 + $0x6] sm:$0x3] }
0x2380   :  { %v2885_v47 = vpop.permute.xlu0 %2884 }
0x2381   :  { %v2887_v48 = vmul.f32 %v4458_v53, %v2885_v47 }
0x2383   :  { %2889 = vrot.lane.b32.xlu1 %v2887_v48, %s4496_s22 }
0x23f5   :  { %v2890_v49 = vpop.permute.xlu1 %2889 }
0x23f6   :  { %4034 = vmatmul.mubr.msk.f32.vlgmr.msra.gmra.mrb[26].mxu1 %vm239_vm3, %v2890_v49 }
0x23f7   :  { %4259 = vmatpush3.bf16.msra.mxu1 %v5021_v24  ;;  %4055 = vmatprep.mubr.msk.f32.mxu1 %vm4494_vm2, %v4495_v11 }
0x23f8   :  { %4260 = vmatprep.subr.bf16.mxu1 %v4493_v3 }
0x23fb   :  { %4262 = vmatpush3.bf16.msra.mxu1 %v5031_v20  ;;  %v2975_v20 = vrot.slane %v2881_v45, 6 }
0x23fc   :  { %4263 = vmatprep.subr.bf16.mxu1 %v4493_v3 }
0x24c9   :  { %v2959_v51 = vpop.f32.mrb[26].mxu1 }
0x24ca   :  { %v2964_v52 = vrot.slane %v2959_v51, 6  ;;  %v4035_v55 = vpop.f32.mrb[27].mxu1 }
0x24cc   :  { %v2966_v56 = vadd.f32 %v2964_v52, %v5058_v8 }
0x24ce   :  { %4461 = vtanh.f32 %v2966_v56  ;;  %v3567_v58 = vmul.f32 -1.442695, %v2966_v56 }
0x24d0   :  { %4463 = vpow2.f32 %v3567_v58 }
0x24d8   :  { %v4462_v33 = vpop.eup %4461 }
0x24d9   :  { %2979 = vrot.lane.b32.xlu0 %v4462_v33, %s4497_s3 }
0x24da   :  { %v4464_v24 = vpop.eup %4463 }
0x24db   :  { %v2970_v59 = vadd.f32 1.0, %v4464_v24 }
0x24dd   :  { %4465 = vrcp.f32 %v2970_v59 }
0x24e7   :  { %v4466_v14 = vpop.eup %4465 }
0x24e8   :  { %v2977_v61 = vmul.f32 %v4466_v14, %v2975_v20 }
0x254b   :  { %v2980_v29 = vpop.permute.xlu0 %2979 }
0x254c   :  { %v2982_v60 = vmul.f32 %v4466_v14, %v2980_v29 }
0x254e   :  { %2984 = vrot.lane.b32.xlu1 %v2982_v60, %s4496_s22 }
0x25c0   :  { %v2985_v36 = vpop.permute.xlu1 %2984 }
0x25c1   :  { %v2987_v62 = vadd.f32 %v2985_v36, %v2977_v61 }
0x25c3   :  { %4467 = vtanh.f32 %v2987_v62  ;;  %v3082_v54 = vrot.slane %v2987_v62, 6 }
0x25cd   :  { %v4468_v0 = vpop.eup %4467 }
0x25ce   :  { %2990 = vrot.lane.b32.xlu0 %v4468_v0, %s4497_s3 }
0x2640   :  { %v2991_v2 = vpop.permute.xlu0 %2990 }
0x2641   :  { %v2993_v7 = vmul.f32 %v4466_v14, %v2991_v2  ;;  %v3314_v2 = vld [vmem:[%s5217_s9 + $0x20] sm:$0xff] }
0x2643   :  { %v2995_v4 = vrot.slane %v2993_v7, 2  ;;  %v3315_v7 = vld [vmem:[%s5217_s9 + $0x28] sm:$0xff] }
0x2645   :  { %2996 = vrot.lane.b32.xlu1 %v2995_v4, %s4496_s22  ;;  %v3316_v4 = vld [vmem:[%s5217_s9 + $0x30] sm:$0xff] }
0x26b7   :  { %v2997_v5 = vpop.permute.xlu1 %2996 }
0x26b8   :  { %4045 = vmatmul.mubr.msk.f32.vlgmr.msra.gmra.mrb[24].mxu0 %vm239_vm3, %v2997_v5  ;;  %v4270_v5 = vpack.c.bf16 %v3315_v7, %v3314_v2 }
0x26b9   :  { %4077 = vmatprep.mubr.msk.f32.mxu0 %vm4494_vm2, %v4495_v11 }
0x26ba   :  { %4271 = vmatpush3.bf16.msra.mxu0 %v4270_v5 }
0x26bb   :  { %4272 = vmatprep.subr.bf16.mxu0 %v4493_v3 }
0x278b   :  { %v3066_v13 = vpop.f32.mrb[24].mxu0 }
0x278c   :  { %v3071_v6 = vrot.slane %v3066_v13, 4  ;;  %v4046_v9 = vpop.f32.mrb[25].mxu0  ;;  %v3317_v13 = vld [vmem:[%s5217_s9 + $0x38] sm:$0xff] }
0x278d   :  { %v4273_v9 = vpack.c.bf16 %v3317_v13, %v3316_v4 }
0x278e   :  { %v3073_v12 = vadd.f32 %v3071_v6, %v5058_v8 }
0x278f   :  { %4274 = vmatpush3.bf16.msra.mxu0 %v4273_v9 }
0x2790   :  { %4469 = vtanh.f32 %v3073_v12  ;;  %v3569_v16 = vmul.f32 -1.442695, %v3073_v12  ;;  %4275 = vmatprep.subr.bf16.mxu0 %v4493_v3 }
0x2792   :  { %4471 = vpow2.f32 %v3569_v16 }
0x279a   :  { %v4470_v15 = vpop.eup %4469 }
0x279b   :  { %3086 = vrot.lane.b32.xlu0 %v4470_v15, %s4497_s3 }
0x279c   :  { %v4472_v17 = vpop.eup %4471 }
0x279d   :  { %v3077_v18 = vadd.f32 1.0, %v4472_v17 }
0x279f   :  { %4473 = vrcp.f32 %v3077_v18 }
0x27a9   :  { %v4474_v19 = vpop.eup %4473 }
0x27aa   :  { %v3084_v1 = vmul.f32 %v4474_v19, %v3082_v54 }
0x280d   :  { %v3087_v63 = vpop.permute.xlu0 %3086 }
0x280e   :  { %v3089_v22 = vmul.f32 %v4474_v19, %v3087_v63  ;;  %v3310_v63 = vld [vmem:[%s5217_s9] sm:$0xff] }
0x2810   :  { %3091 = vrot.lane.b32.xlu1 %v3089_v22, %s4496_s22  ;;  %v3311_v22 = vld [vmem:[%s5217_s9 + $0x8] sm:$0xff] }
0x2811   :  { %v4276_v54 = vpack.c.bf16 %v3311_v22, %v3310_v63 }
0x2882   :  { %v3092_v23 = vpop.permute.xlu1 %3091 }
0x2883   :  { %v3094_v50 = vadd.f32 %v3092_v23, %v3084_v1  ;;  %v3312_v1 = vld [vmem:[%s5217_s9 + $0x10] sm:$0xff]  ;;  %v3313_v23 = vld [vmem:[%s5217_s9 + $0x18] sm:$0xff] }
0x2885   :  { %4475 = vtanh.f32 %v3094_v50  ;;  %v3189_v29 = vrot.slane %v3094_v50, 6 }
0x288f   :  { %v4476_v37 = vpop.eup %4475 }
0x2890   :  { %3097 = vrot.lane.b32.xlu0 %v4476_v37, %s4497_s3  ;;  %v4279_v37 = vpack.c.bf16 %v3313_v23, %v3312_v1 }
0x2902   :  { %v3098_v40 = vpop.permute.xlu0 %3097 }
0x2903   :  { %v3100_v57 = vmul.f32 %v4474_v19, %v3098_v40 }
0x2905   :  { %v3102_v10 = vrot.slane %v3100_v57, 4  ;;  %v16_v57 = vstv %s5218_s10 }
0x2906   :  { %17 = vst [vmem:[#allocation4] sm:$0x1] %v16_v57 }
0x2907   :  { %3103 = vrot.lane.b32.xlu1 %v3102_v10, %s4496_s22 }
0x2979   :  { %v3104_v31 = vpop.permute.xlu1 %3103 }
0x297a   :  { %4056 = vmatmul.mubr.msk.f32.vlgmr.msra.gmra.mrb[28].mxu1 %vm239_vm3, %v3104_v31 }
0x297b   :  { %4265 = vmatpush3.bf16.msra.mxu1 %v4264_v27  ;;  %4066 = vmatprep.mubr.msk.f32.mxu1 %vm4494_vm2, %v4495_v11  ;;  %v3576_v27 = vld [vmem:[#allocation4] ss:$0 sm:$0xff] }
0x297c   :  { %4266 = vmatprep.subr.bf16.mxu1 %v4493_v3 }
0x297f   :  { %4268 = vmatpush3.bf16.msra.mxu1 %v4267_v32 }
0x2982   :  { %4067 = vmatmul.mubr.msk.f32.vlgmr.msra.gmra.mrb[20].mxu1 %vm239_vm3, %v3554_v34 }
0x2a4d   :  { %v3173_v35 = vpop.f32.mrb[28].mxu1 }
0x2a4e   :  { %v3178_v38 = vrot.slane %v3173_v35, 2  ;;  %v4057_v39 = vpop.f32.mrb[29].mxu1 }
0x2a50   :  { %v3180_v53 = vadd.f32 %v3178_v38, %v5058_v8 }
0x2a52   :  { %4477 = vtanh.f32 %v3180_v53  ;;  %v3571_v8 = vmul.f32 -1.442695, %v3180_v53 }
0x2a55   :  { %v3277_v43 = vpop.f32.mrb[20].mxu1 }
0x2a56   :  { %v4281_v21 = vadd.f32 %v3551_v41, %v3277_v43  ;;  %v4068_v42 = vpop.f32.mrb[21].mxu1 }
0x2a58   :  { %4479 = vtanh.f32 %v4281_v21  ;;  %v3573_v47 = vmul.f32 -1.442695, %v4281_v21 }
0x2a59   :  { %4481 = vpow2.f32 %v3571_v8 }
0x2a5a   :  { %4483 = vpow2.f32 %v3573_v47 }
0x2a5c   :  { %v4478_v44 = vpop.eup %4477 }
0x2a5d   :  { %3193 = vrot.lane.b32.xlu1 %v4478_v44, %s4497_s3 }
0x2a62   :  { %v4480_v45 = vpop.eup %4479 }
0x2a63   :  { %3295 = vrot.lane.b32.xlu0 %v4480_v45, %s4497_s3  ;;  %v4482_v48 = vpop.eup %4481 }
0x2a64   :  { %v3184_v49 = vadd.f32 1.0, %v4482_v48  ;;  %v4484_v51 = vpop.eup %4483 }
0x2a65   :  { %v3285_v52 = vadd.f32 1.0, %v4484_v51 }
0x2a66   :  { %4485 = vrcp.f32 %v3184_v49 }
0x2a67   :  { %3290 = vrot.lane.b32.xlu0 %v3555_v46, %s4496_s22  ;;  %4487 = vrcp.f32 %v3285_v52 }
0x2a70   :  { %v4486_v55 = vpop.eup %4485 }
0x2a71   :  { %v4488_v58 = vpop.eup %4487  ;;  %v3191_v60 = vmul.f32 %v4486_v55, %v3189_v29 }
0x2acf   :  { %v3194_v56 = vpop.permute.xlu1 %3193 }
0x2ad0   :  { %v3196_v33 = vmul.f32 %v4486_v55, %v3194_v56 }
0x2ad2   :  { %3198 = vrot.lane.b32.xlu0 %v3196_v33, %s4496_s22 }
0x2ad5   :  { %v3296_v24 = vpop.permute.xlu0 %3295 }
0x2ad6   :  { %v3298_v59 = vmul.f32 %v4488_v58, %v3296_v24 }
0x2ad8   :  { %3300 = vrot.lane.b32.xlu1 %v3298_v59, %s4496_s22 }
0x2ad9   :  { %v3291_v14 = vpop.permute.xlu0 %3290 }
0x2ada   :  { %v3293_v36 = vmul.f32 %v4488_v58, %v3291_v14 }
0x2b44   :  { %v3199_v20 = vpop.permute.xlu0 %3198 }
0x2b45   :  { %v3201_v61 = vadd.f32 %v3199_v20, %v3191_v60 }
0x2b47   :  { %4489 = vtanh.f32 %v3201_v61 }
0x2b4a   :  { %v3301_v62 = vpop.permute.xlu1 %3300 }
0x2b4b   :  { %v3303_v0 = vadd.f32 %v3301_v62, %v3293_v36 }
0x2b4d   :  { %4491 = vtanh.f32 %v3303_v0 }
0x2b51   :  { %v4490_v6 = vpop.eup %4489 }
0x2b52   :  { %3204 = vrot.lane.b32.xlu0 %v4490_v6, %s4497_s3 }
0x2b57   :  { %v4492_v12 = vpop.eup %4491 }
0x2b58   :  { %3306 = vrot.lane.b32.xlu1 %v4492_v12, %s4497_s3 }
0x2bc4   :  { %v3205_v15 = vpop.permute.xlu0 %3204 }
0x2bc5   :  { %v3207_v16 = vmul.f32 %v4486_v55, %v3205_v15 }
0x2bc7   :  { %v3394_v17 = vrot.slane %v3207_v16, 6 }
0x2bc9   :  { %3395 = vrot.lane.b32.xlu0 %v3394_v17, %s4496_s22 }
0x2bca   :  { %v3307_v18 = vpop.permute.xlu1 %3306 }
0x2bcb   :  { %v3309_v19 = vmul.f32 %v4488_v58, %v3307_v18 }
0x2bcd   :  { %3319 = vrot.lane.b32.xlu1 %v3309_v19, %s4496_s22 }
0x2c3b   :  { %v3396_v40 = vpop.permute.xlu0 %3395 }
0x2c3f   :  { %v3320_v50 = vpop.permute.xlu1 %3319 }
0x2c40   :  { %4078 = vmatmul.mubr.msk.f32.vlgmr.msra.gmra.mrb[26].mxu0 %vm239_vm3, %v3320_v50 }
0x2c41   :  { %4277 = vmatpush3.bf16.msra.mxu0 %v4276_v54  ;;  %4088 = vmatprep.mubr.msk.f32.mxu0 %vm4494_vm2, %v4495_v11 }
0x2c42   :  { %4278 = vmatprep.subr.bf16.mxu0 %v4493_v3 }
0x2c45   :  { %4280 = vmatpush3.bf16.msra.mxu0 %v4279_v37 }
0x2c48   :  { %4089 = vmatmul.mubr.msk.f32.vlgmr.msra.gmra.mrb[28].mxu0 %vm239_vm3, %v3396_v40 }
0x2d13   :  { %v3389_v10 = vpop.f32.mrb[26].mxu0 }
0x2d14   :  { %v4079_v25 = vpop.f32.mrb[27].mxu0 }
0x2d1b   :  { %v3465_v26 = vpop.f32.mrb[28].mxu0 }
0x2d1c   :  { %v3466_v28 = vadd.f32 %v3465_v26, %v3389_v10  ;;  %v4090_v30 = vpop.f32.mrb[29].mxu0 }
0x2d1e   :  { %v3476_v31 = vadd.f32 %v3576_v27, %v3466_v28 }
0x2d20   :  { %3478 = vst.msk [vmem:[%s5219_s11] sm:$0x3] %vm3477_vm8, %v3476_v31 }

</bundles_post_ra>
